<compile_context>
chip_gen: v5e
topology: v5e:2x2
jax: 0.10.0
libtpu: 0.0.40
codegen_flags: <defaults>
</compile_context>

<pallas_src>
import math
import jax
import jax.numpy as jnp
from jax.experimental import pallas as pl
from jax.experimental.pallas import tpu as pltpu


def _round_up(x, m):
    return ((x + m - 1) // m) * m


def _vmem_estimate(H, W, Cin, Cp, TH):
    """Rough VMEM footprint (bytes) incl. (8,128) tile padding + double buffers."""
    lane, sub = 128, 8
    in_plane = H * _round_up(W, sub) * _round_up(Cin, lane) * 4 * 2   # resident x
    out_blk = TH * _round_up(W, sub) * (2 * Cp) * 4 * 2               # output strip
    scratch = (TH + 2) * _round_up(W + 2, sub) * Cp * 4               # x1 halo scratch
    weights = (_round_up(Cin, sub) * Cp + 2 * Cp + 3 * sub * Cp) * 4 * 2
    return in_plane + out_blk + scratch + weights


def _pick_strip(H, W, Cin, Cp, budget=40 * 1024 * 1024):
    """Largest strip height that divides H and fits the VMEM budget."""
    cands = sorted({t for t in (64, 32, 16, 8, 4, 2, 1, H) if H % t == 0},
                   reverse=True)
    for t in cands:
        if _vmem_estimate(H, W, Cin, Cp, t) <= budget:
            return t
    return cands[-1]


# ----------------------------------------------------------------------------
# Fused GhostModule kernel
#   x_ref    : (H, W, Cin)       unpadded input plane (whole batch element)
#   w1_ref   : (Cin, Cp)         1x1 conv weight, BN1 scale folded in
#   b1_ref   : (1, Cp)           BN1 folded bias
#   w2_ref   : (3, 3, Cp)        depthwise taps, BN2 scale folded in
#   b2_ref   : (1, Cp)           BN2 folded bias
#   o_ref    : (TH, W, 2*Cp)     out[..., :Cp] = x1, out[..., Cp:] = x2
#   x1p_ref  : (TH+2, W+2, Cp)   VMEM scratch: zero-padded x1 for this strip
# ----------------------------------------------------------------------------
def _ghost_fused_kernel(x_ref, w1_ref, b1_ref, w2_ref, b2_ref, o_ref, x1p_ref):
    TH, W, Cp2 = o_ref.shape
    Cp = Cp2 // 2
    H, _, Cin = x_ref.shape
    THp = TH + 2
    RB = 8 if TH >= 8 else TH          # row-chunk size: bounds live vregs

    h = pl.program_id(1)
    base = h * TH
    if TH % 8 == 0:
        base = pl.multiple_of(base, 8)  # aligned sublane window on x_ref

    # hoisted loads (not repeated inside the unrolled loops)
    w1 = w1_ref[...]                    # (Cin, Cp)
    b1 = b1_ref[...]                    # (1, Cp)
    b2 = b2_ref[...]                    # (1, Cp)

    # ---- zero the depthwise padding columns of the x1 scratch --------------
    zcol = jnp.zeros((THp, 1, Cp), jnp.float32)
    x1p_ref[:, 0:1, :] = zcol
    x1p_ref[:, W + 1:W + 2, :] = zcol

    # ---- stage 1: 1x1 conv (BN folded) + ReLU -------------------------------
    # Interior strip rows in RB-row chunks: one batched MXU matmul per chunk.
    # Each chunk is written straight to the output block (x1 half) and to the
    # scratch interior (so stage 2 never re-reads it from HBM / out).
    r0 = 0
    while r0 < TH:
        rb = min(RB, TH - r0)
        xin = x_ref[pl.ds(base + r0, rb), :, :]                  # (rb, W, Cin)
        if W % 8 == 0:
            y = jnp.dot(xin.reshape(rb * W, Cin), w1,
                        preferred_element_type=jnp.float32)
            y = jnp.maximum(y + b1, 0.0).reshape(rb, W, Cp)
            o_ref[r0:r0 + rb, :, :Cp] = y
            x1p_ref[r0 + 1:r0 + rb + 1, 1:W + 1, :] = y
        else:
            # lowering-safe fallback for W not a multiple of 8
            for r in range(rb):
                yr = jnp.dot(xin[r], w1, preferred_element_type=jnp.float32)
                yr = jnp.maximum(yr + b1, 0.0)
                o_ref[r0 + r, :, :Cp] = yr
                x1p_ref[r0 + r + 1, 1:W + 1, :] = yr
        r0 += rb

    # Halo rows (neighbours above / below the strip), recomputed from the
    # resident input plane and zero-masked at the image border.
    def _halo_row(g_img, valid, dst_row):
        xrow = x_ref[g_img]                                      # (W, Cin)
        yr = jnp.dot(xrow, w1, preferred_element_type=jnp.float32)
        yr = jnp.maximum(yr + b1, 0.0) * valid
        x1p_ref[dst_row:dst_row + 1, 1:W + 1, :] = yr[None]

    top_g = base - 1
    _halo_row(jnp.maximum(top_g, 0),
              (top_g >= 0).astype(jnp.float32), 0)
    bot_g = base + TH
    _halo_row(jnp.minimum(bot_g, H - 1),
              (bot_g <= H - 1).astype(jnp.float32), TH + 1)

    # ---- stage 2: depthwise 3x3 (BN folded) + ReLU --------------------------
    # RB-row chunks; each of the 9 taps is a fresh ref slice so its load dies
    # right after the FMA (keeps live vregs well under 64, no spills).
    r0 = 0
    while r0 < TH:
        rb = min(RB, TH - r0)
        acc = jnp.zeros((rb, W, Cp), jnp.float32)
        for dy in range(3):
            for dx in range(3):
                tap = x1p_ref[r0 + dy:r0 + dy + rb, dx:dx + W, :]
                acc = acc + tap * w2_ref[dy, dx, :]
        o_ref[r0:r0 + rb, :, Cp:] = jnp.maximum(acc + b2, 0.0)
        r0 += rb


def _ghost_fused_call(x, w1p, b1p, w2p, b2p, H, W, TH):
    N = x.shape[0]
    Cin = x.shape[-1]
    Cp = w1p.shape[1]
    nH = H // TH

    flops = (2 * N * (H * W + 2 * nH * W) * Cin * Cp   # 1x1 conv (+ halo recompute)
             + 2 * 9 * N * H * W * Cp)                 # depthwise 3x3
    bytes_acc = 4 * (x.size + w1p.size + b1p.size + w2p.size + b2p.size
                     + N * H * W * 2 * Cp)

    return pl.pallas_call(
        _ghost_fused_kernel,
        out_shape=jax.ShapeDtypeStruct((N, H, W, 2 * Cp), jnp.float32),
        grid=(N, nH),
        in_specs=[
            # whole unpadded input plane per batch element; index map does not
            # depend on the strip axis, so it stays resident across strips.
            pl.BlockSpec((None, H, W, Cin), lambda n, h: (n, 0, 0, 0)),
            pl.BlockSpec((Cin, Cp), lambda n, h: (0, 0)),
            pl.BlockSpec((1, Cp), lambda n, h: (0, 0)),
            pl.BlockSpec((3, 3, Cp), lambda n, h: (0, 0, 0)),
            pl.BlockSpec((1, Cp), lambda n, h: (0, 0)),
        ],
        out_specs=pl.BlockSpec((None, TH, W, 2 * Cp), lambda n, h: (n, h, 0, 0)),
        scratch_shapes=[pltpu.VMEM((TH + 2, W + 2, Cp), jnp.float32)],
        compiler_params=pltpu.CompilerParams(
            dimension_semantics=("parallel", "parallel"),
            # blocks are sized (via _pick_strip) to fit well below this on all
            # generations, including v7x's 64 MiB physical VMEM.
            vmem_limit_bytes=48 * 1024 * 1024,
        ),
        cost_estimate=pl.CostEstimate(flops=flops, transcendentals=0,
                                      bytes_accessed=bytes_acc),
    )(x, w1p, b1p, w2p, b2p)


# ----------------------------------------------------------------------------
# Parameter construction (deterministic, synthetic)
# ----------------------------------------------------------------------------
def make_ghost_params(key, in_c, out_c, ratio=2, dw_size=3):
    init_c = math.ceil(out_c / ratio)
    new_c = init_c * (ratio - 1)
    assert new_c == init_c, "ratio=2 assumed"
    ks = jax.random.split(key, 10)
    p = {}
    # primary 1x1 conv weight: torch shape (init_c, in_c, 1, 1)
    p["w1"] = jax.random.normal(ks[0], (init_c, in_c, 1, 1), jnp.float32) * 0.2
    p["bn1_gamma"] = 1.0 + 0.1 * jax.random.normal(ks[1], (init_c,), jnp.float32)
    p["bn1_beta"] = 0.1 * jax.random.normal(ks[2], (init_c,), jnp.float32)
    p["bn1_mean"] = 0.05 * jax.random.normal(ks[3], (init_c,), jnp.float32)
    p["bn1_var"] = jax.random.uniform(ks[4], (init_c,), jnp.float32, 0.5, 1.5)
    # depthwise conv weight: torch shape (new_c, 1, 3, 3), groups=init_c
    p["w2"] = jax.random.normal(ks[5], (new_c, 1, dw_size, dw_size), jnp.float32) * 0.2
    p["bn2_gamma"] = 1.0 + 0.1 * jax.random.normal(ks[6], (new_c,), jnp.float32)
    p["bn2_beta"] = 0.1 * jax.random.normal(ks[7], (new_c,), jnp.float32)
    p["bn2_mean"] = 0.05 * jax.random.normal(ks[8], (new_c,), jnp.float32)
    p["bn2_var"] = jax.random.uniform(ks[9], (new_c,), jnp.float32, 0.5, 1.5)
    return p, init_c, new_c


def _fold_bn(gamma, beta, mean, var, eps=1e-5):
    scale = gamma / jnp.sqrt(var + eps)
    bias = beta - mean * scale
    return scale, bias


# ----------------------------------------------------------------------------
# GhostModule forward, NHWC hot path (no layout transposes)
# ----------------------------------------------------------------------------
def ghost_module_forward_nhwc(x_nhwc, params, init_c):
    N, H, W, Cin = x_nhwc.shape
    C = init_c
    Cp = _round_up(C, 128)          # lane-align the in-kernel channel dim
    TH = _pick_strip(H, W, Cin, Cp)

    s1, b1 = _fold_bn(params["bn1_gamma"], params["bn1_beta"],
                      params["bn1_mean"], params["bn1_var"])
    s2, b2 = _fold_bn(params["bn2_gamma"], params["bn2_beta"],
                      params["bn2_mean"], params["bn2_var"])

    # BN scales folded into the weights; pad output channels to Cp with zeros
    # (padded channels stay exactly 0 through ReLU and the depthwise stage).
    w1 = params["w1"].reshape(C, Cin).T * s1[None, :]                 # (Cin, C)
    w1p = jnp.zeros((Cin, Cp), jnp.float32).at[:, :C].set(w1)
    b1p = jnp.zeros((1, Cp), jnp.float32).at[0, :C].set(b1)
    w2 = jnp.transpose(params["w2"].reshape(C, 3, 3), (1, 2, 0)) * s2  # (3,3,C)
    w2p = jnp.zeros((3, 3, Cp), jnp.float32).at[:, :, :C].set(w2)
    b2p = jnp.zeros((1, Cp), jnp.float32).at[0, :C].set(b2)

    # No input pre-padding: the kernel handles the depthwise halo internally.
    out_p = _ghost_fused_call(x_nhwc.astype(jnp.float32),
                              w1p, b1p, w2p, b2p, H, W, TH)

    if Cp == C:
        # concat of the two adjacent halves is the identity -> no extra pass.
        return out_p
    # strip the channel padding; fuses with the caller's layout handling.
    x1 = out_p[..., :C]
    x2 = out_p[..., Cp:Cp + C]
    return jnp.concatenate([x1, x2], axis=-1)            # (N, H, W, 2C)


# NCHW adapter matching the PyTorch interface.
def ghost_module_forward(x_nchw, params, init_c):
    x_nhwc = jnp.transpose(x_nchw, (0, 2, 3, 1))
    out_nhwc = ghost_module_forward_nhwc(x_nhwc, params, init_c)
    return jnp.transpose(out_nhwc, (0, 3, 1, 2))


# ----------------------------------------------------------------------------
# Pure-JAX reference (correctness check only)
# ----------------------------------------------------------------------------
def ghost_reference(x_nchw, params, init_c):
    N, Cin, H, W = x_nchw.shape
    x_nhwc = jnp.transpose(x_nchw, (0, 2, 3, 1)).astype(jnp.float32)
    w1_mat = params["w1"].reshape(init_c, Cin).T
    s1, b1 = _fold_bn(params["bn1_gamma"], params["bn1_beta"],
                      params["bn1_mean"], params["bn1_var"])
    x1 = jnp.maximum(jnp.einsum("nhwc,cd->nhwd", x_nhwc, w1_mat) * s1 + b1, 0.0)

    w2_dw = jnp.transpose(params["w2"].reshape(init_c, 3, 3), (1, 2, 0))
    s2, b2 = _fold_bn(params["bn2_gamma"], params["bn2_beta"],
                      params["bn2_mean"], params["bn2_var"])
    xp = jnp.pad(x1, ((0, 0), (1, 1), (1, 1), (0, 0)))
    acc = jnp.zeros_like(x1)
    for dy in range(3):
        for dx in range(3):
            acc = acc + xp[:, dy:dy + H, dx:dx + W, :] * w2_dw[dy, dx, :]
    x2 = jnp.maximum(acc * s2 + b2, 0.0)
    out = jnp.concatenate([x1, x2], axis=-1)
    return jnp.transpose(out, (0, 3, 1, 2))


if __name__ == "__main__":
    key = jax.random.PRNGKey(0)
    k_x, k_p = jax.random.split(key)

    # Small shapes: batch=2, in_c=4, out_c=8, spatial 16x16 (NCHW like PyTorch)
    N, in_c, out_c, H, W = 2, 4, 8, 16, 16
    x = jax.random.normal(k_x, (N, in_c, H, W), jnp.float32)

    params, init_c, new_c = make_ghost_params(k_p, in_c, out_c)

    out = jax.block_until_ready(ghost_module_forward(x, params, init_c))
    ref = jax.block_until_ready(ghost_reference(x, params, init_c))

    assert out.shape == (N, out_c, H, W), out.shape
    assert jnp.allclose(out, ref, atol=1e-4, rtol=1e-4), "mismatch vs reference"

    print("KERNEL_OK")
</pallas_src>

<mosaic_0001>
module attributes {stable_mosaic.version = 11 : i64} {
  func.func @_ghost_fused_kernel(%arg0: i32, %arg1: i32, %arg2: memref<1x16x16x4xf32, #tpu.memory_space<vmem>>, %arg3: memref<4x128xf32, #tpu.memory_space<vmem>>, %arg4: memref<1x128xf32, #tpu.memory_space<vmem>>, %arg5: memref<3x3x128xf32, #tpu.memory_space<vmem>>, %arg6: memref<1x128xf32, #tpu.memory_space<vmem>>, %arg7: memref<1x16x16x256xf32, #tpu.memory_space<vmem>>, %arg8: memref<18x18x128xf32, #tpu.memory_space<vmem>>) attributes {dimension_semantics = [#tpu.dimension_semantics<parallel>, #tpu.dimension_semantics<parallel>], iteration_bounds = array<i64: 2, 1>, scalar_prefetch = 0 : i64, scratch_operands = 1 : i64, tpu.core_type = #tpu.core_type<tc>, window_params = [{transform_indices = @transform_0, window_bounds = array<i64: 1, 16, 16, 4>}, {pipeline_mode = #tpu.pipeline_mode<synchronous>, transform_indices = @transform_1, window_bounds = array<i64: 4, 128>}, {pipeline_mode = #tpu.pipeline_mode<synchronous>, transform_indices = @transform_2, window_bounds = array<i64: 1, 128>}, {pipeline_mode = #tpu.pipeline_mode<synchronous>, transform_indices = @transform_3, window_bounds = array<i64: 3, 3, 128>}, {pipeline_mode = #tpu.pipeline_mode<synchronous>, transform_indices = @transform_4, window_bounds = array<i64: 1, 128>}, {transform_indices = @transform_5, window_bounds = array<i64: 1, 16, 16, 256>}]} {
    %c16_i32 = arith.constant 16 : i32
    %0 = arith.muli %arg1, %c16_i32 : i32
    %1 = tpu.assume_multiple %0, 8 : i32
    %c0 = arith.constant 0 : index
    %c0_0 = arith.constant 0 : index
    %2 = vector.load %arg3[%c0, %c0_0] : memref<4x128xf32, #tpu.memory_space<vmem>>, vector<4x128xf32>
    %c0_1 = arith.constant 0 : index
    %c0_2 = arith.constant 0 : index
    %3 = vector.load %arg4[%c0_1, %c0_2] : memref<1x128xf32, #tpu.memory_space<vmem>>, vector<1x128xf32>
    %c0_3 = arith.constant 0 : index
    %c0_4 = arith.constant 0 : index
    %4 = vector.load %arg6[%c0_3, %c0_4] : memref<1x128xf32, #tpu.memory_space<vmem>>, vector<1x128xf32>
    %cst = arith.constant 0.000000e+00 : f32
    %5 = vector.broadcast %cst : f32 to vector<18x1x128xf32>
    %c0_5 = arith.constant 0 : index
    %c0_6 = arith.constant 0 : index
    %c0_7 = arith.constant 0 : index
    %6 = vector.load %arg8[%c0_5, %c0_6, %c0_7] : memref<18x18x128xf32, #tpu.memory_space<vmem>>, vector<18x1x128xf32>
    tpu.vector_store %arg8[%c0_5, %c0_6, %c0_7], %5 {strides = array<i32>} : memref<18x18x128xf32, #tpu.memory_space<vmem>>, vector<18x1x128xf32>,
    %c0_8 = arith.constant 0 : index
    %c17 = arith.constant 17 : index
    %c0_9 = arith.constant 0 : index
    %7 = vector.load %arg8[%c0_8, %c17, %c0_9] : memref<18x18x128xf32, #tpu.memory_space<vmem>>, vector<18x1x128xf32>
    tpu.vector_store %arg8[%c0_8, %c17, %c0_9], %5 {strides = array<i32>} : memref<18x18x128xf32, #tpu.memory_space<vmem>>, vector<18x1x128xf32>,
    %c0_i32 = arith.constant 0 : i32
    %8 = arith.addi %1, %c0_i32 : i32
    %c0_10 = arith.constant 0 : index
    %9 = arith.index_cast %8 : i32 to index
    %c0_11 = arith.constant 0 : index
    %c0_12 = arith.constant 0 : index
    %10 = vector.load %arg2[%c0_10, %9, %c0_11, %c0_12] : memref<1x16x16x4xf32, #tpu.memory_space<vmem>>, vector<1x8x16x4xf32>
    %11 = vector.shape_cast %10 : vector<1x8x16x4xf32> to vector<8x16x4xf32>
    %12 = vector.shape_cast %11 : vector<8x16x4xf32> to vector<128x4xf32>
    %cst_13 = arith.constant dense<0.000000e+00> : vector<128x128xf32>
    %13 = tpu.matmul %12, %2, %cst_13 {dimension_numbers = #tpu.dot_dimension_numbers<[1], [0], [0], [1], [0, 0, 1, 1], [], []>} : vector<128x4xf32>, vector<4x128xf32>, vector<128x128xf32> -> vector<128x128xf32>
    %14 = vector.broadcast %3 : vector<1x128xf32> to vector<128x128xf32>
    %15 = arith.addf %13, %14 : vector<128x128xf32>
    %cst_14 = arith.constant 0.000000e+00 : f32
    %16 = vector.broadcast %cst_14 : f32 to vector<128x128xf32>
    %17 = arith.maximumf %15, %16 : vector<128x128xf32>
    %18 = vector.shape_cast %17 : vector<128x128xf32> to vector<8x16x128xf32>
    %c0_15 = arith.constant 0 : index
    %c0_16 = arith.constant 0 : index
    %c0_17 = arith.constant 0 : index
    %c0_18 = arith.constant 0 : index
    %19 = vector.load %arg7[%c0_15, %c0_16, %c0_17, %c0_18] : memref<1x16x16x256xf32, #tpu.memory_space<vmem>>, vector<1x8x16x128xf32>
    %20 = vector.shape_cast %19 : vector<1x8x16x128xf32> to vector<8x16x128xf32>
    %21 = vector.shape_cast %18 : vector<8x16x128xf32> to vector<1x8x16x128xf32>
    tpu.vector_store %arg7[%c0_15, %c0_16, %c0_17, %c0_18], %21 {strides = array<i32>} : memref<1x16x16x256xf32, #tpu.memory_space<vmem>>, vector<1x8x16x128xf32>,
    %c1 = arith.constant 1 : index
    %c1_19 = arith.constant 1 : index
    %c0_20 = arith.constant 0 : index
    %22 = vector.load %arg8[%c1, %c1_19, %c0_20] : memref<18x18x128xf32, #tpu.memory_space<vmem>>, vector<8x16x128xf32>
    tpu.vector_store %arg8[%c1, %c1_19, %c0_20], %18 {strides = array<i32>} : memref<18x18x128xf32, #tpu.memory_space<vmem>>, vector<8x16x128xf32>,
    %c8_i32 = arith.constant 8 : i32
    %23 = arith.addi %1, %c8_i32 : i32
    %c0_21 = arith.constant 0 : index
    %24 = arith.index_cast %23 : i32 to index
    %c0_22 = arith.constant 0 : index
    %c0_23 = arith.constant 0 : index
    %25 = vector.load %arg2[%c0_21, %24, %c0_22, %c0_23] : memref<1x16x16x4xf32, #tpu.memory_space<vmem>>, vector<1x8x16x4xf32>
    %26 = vector.shape_cast %25 : vector<1x8x16x4xf32> to vector<8x16x4xf32>
    %27 = vector.shape_cast %26 : vector<8x16x4xf32> to vector<128x4xf32>
    %cst_24 = arith.constant dense<0.000000e+00> : vector<128x128xf32>
    %28 = tpu.matmul %27, %2, %cst_24 {dimension_numbers = #tpu.dot_dimension_numbers<[1], [0], [0], [1], [0, 0, 1, 1], [], []>} : vector<128x4xf32>, vector<4x128xf32>, vector<128x128xf32> -> vector<128x128xf32>
    %29 = vector.broadcast %3 : vector<1x128xf32> to vector<128x128xf32>
    %30 = arith.addf %28, %29 : vector<128x128xf32>
    %cst_25 = arith.constant 0.000000e+00 : f32
    %31 = vector.broadcast %cst_25 : f32 to vector<128x128xf32>
    %32 = arith.maximumf %30, %31 : vector<128x128xf32>
    %33 = vector.shape_cast %32 : vector<128x128xf32> to vector<8x16x128xf32>
    %c0_26 = arith.constant 0 : index
    %c8 = arith.constant 8 : index
    %c0_27 = arith.constant 0 : index
    %c0_28 = arith.constant 0 : index
    %34 = vector.load %arg7[%c0_26, %c8, %c0_27, %c0_28] : memref<1x16x16x256xf32, #tpu.memory_space<vmem>>, vector<1x8x16x128xf32>
    %35 = vector.shape_cast %34 : vector<1x8x16x128xf32> to vector<8x16x128xf32>
    %36 = vector.shape_cast %33 : vector<8x16x128xf32> to vector<1x8x16x128xf32>
    tpu.vector_store %arg7[%c0_26, %c8, %c0_27, %c0_28], %36 {strides = array<i32>} : memref<1x16x16x256xf32, #tpu.memory_space<vmem>>, vector<1x8x16x128xf32>,
    %c9 = arith.constant 9 : index
    %c1_29 = arith.constant 1 : index
    %c0_30 = arith.constant 0 : index
    %37 = vector.load %arg8[%c9, %c1_29, %c0_30] : memref<18x18x128xf32, #tpu.memory_space<vmem>>, vector<8x16x128xf32>
    tpu.vector_store %arg8[%c9, %c1_29, %c0_30], %33 {strides = array<i32>} : memref<18x18x128xf32, #tpu.memory_space<vmem>>, vector<8x16x128xf32>,
    %c1_i32 = arith.constant 1 : i32
    %38 = arith.subi %1, %c1_i32 : i32
    %c0_i32_31 = arith.constant 0 : i32
    %39 = arith.maxsi %38, %c0_i32_31 : i32
    %c0_i32_32 = arith.constant 0 : i32
    %40 = arith.cmpi sge, %38, %c0_i32_32 : i32
    %41 = arith.extui %40 : i1 to i32
    %42 = arith.sitofp %41 : i32 to f32
    %c0_33 = arith.constant 0 : index
    %43 = arith.index_cast %39 : i32 to index
    %c0_34 = arith.constant 0 : index
    %c0_35 = arith.constant 0 : index
    %44 = vector.load %arg2[%c0_33, %43, %c0_34, %c0_35] : memref<1x16x16x4xf32, #tpu.memory_space<vmem>>, vector<1x1x16x4xf32>
    %45 = vector.shape_cast %44 : vector<1x1x16x4xf32> to vector<16x4xf32>
    %cst_36 = arith.constant dense<0.000000e+00> : vector<16x128xf32>
    %46 = tpu.matmul %45, %2, %cst_36 {dimension_numbers = #tpu.dot_dimension_numbers<[1], [0], [0], [1], [0, 0, 1, 1], [], []>} : vector<16x4xf32>, vector<4x128xf32>, vector<16x128xf32> -> vector<16x128xf32>
    %47 = vector.broadcast %3 : vector<1x128xf32> to vector<16x128xf32>
    %48 = arith.addf %46, %47 : vector<16x128xf32>
    %cst_37 = arith.constant 0.000000e+00 : f32
    %49 = vector.broadcast %cst_37 : f32 to vector<16x128xf32>
    %50 = arith.maximumf %48, %49 : vector<16x128xf32>
    %51 = vector.broadcast %42 : f32 to vector<16x128xf32>
    %52 = arith.mulf %50, %51 : vector<16x128xf32>
    %53 = vector.shape_cast %52 : vector<16x128xf32> to vector<1x16x128xf32>
    %c0_38 = arith.constant 0 : index
    %c1_39 = arith.constant 1 : index
    %c0_40 = arith.constant 0 : index
    %54 = vector.load %arg8[%c0_38, %c1_39, %c0_40] : memref<18x18x128xf32, #tpu.memory_space<vmem>>, vector<1x16x128xf32>
    tpu.vector_store %arg8[%c0_38, %c1_39, %c0_40], %53 {strides = array<i32>} : memref<18x18x128xf32, #tpu.memory_space<vmem>>, vector<1x16x128xf32>,
    %c16_i32_41 = arith.constant 16 : i32
    %55 = arith.addi %1, %c16_i32_41 : i32
    %c15_i32 = arith.constant 15 : i32
    %56 = arith.minsi %55, %c15_i32 : i32
    %c15_i32_42 = arith.constant 15 : i32
    %57 = arith.cmpi sle, %55, %c15_i32_42 : i32
    %58 = arith.extui %57 : i1 to i32
    %59 = arith.sitofp %58 : i32 to f32
    %c0_43 = arith.constant 0 : index
    %60 = arith.index_cast %56 : i32 to index
    %c0_44 = arith.constant 0 : index
    %c0_45 = arith.constant 0 : index
    %61 = vector.load %arg2[%c0_43, %60, %c0_44, %c0_45] : memref<1x16x16x4xf32, #tpu.memory_space<vmem>>, vector<1x1x16x4xf32>
    %62 = vector.shape_cast %61 : vector<1x1x16x4xf32> to vector<16x4xf32>
    %cst_46 = arith.constant dense<0.000000e+00> : vector<16x128xf32>
    %63 = tpu.matmul %62, %2, %cst_46 {dimension_numbers = #tpu.dot_dimension_numbers<[1], [0], [0], [1], [0, 0, 1, 1], [], []>} : vector<16x4xf32>, vector<4x128xf32>, vector<16x128xf32> -> vector<16x128xf32>
    %64 = vector.broadcast %3 : vector<1x128xf32> to vector<16x128xf32>
    %65 = arith.addf %63, %64 : vector<16x128xf32>
    %cst_47 = arith.constant 0.000000e+00 : f32
    %66 = vector.broadcast %cst_47 : f32 to vector<16x128xf32>
    %67 = arith.maximumf %65, %66 : vector<16x128xf32>
    %68 = vector.broadcast %59 : f32 to vector<16x128xf32>
    %69 = arith.mulf %67, %68 : vector<16x128xf32>
    %70 = vector.shape_cast %69 : vector<16x128xf32> to vector<1x16x128xf32>
    %c17_48 = arith.constant 17 : index
    %c1_49 = arith.constant 1 : index
    %c0_50 = arith.constant 0 : index
    %71 = vector.load %arg8[%c17_48, %c1_49, %c0_50] : memref<18x18x128xf32, #tpu.memory_space<vmem>>, vector<1x16x128xf32>
    tpu.vector_store %arg8[%c17_48, %c1_49, %c0_50], %70 {strides = array<i32>} : memref<18x18x128xf32, #tpu.memory_space<vmem>>, vector<1x16x128xf32>,
    %cst_51 = arith.constant 0.000000e+00 : f32
    %72 = vector.broadcast %cst_51 : f32 to vector<8x16x128xf32>
    %c0_52 = arith.constant 0 : index
    %c0_53 = arith.constant 0 : index
    %c0_54 = arith.constant 0 : index
    %73 = vector.load %arg8[%c0_52, %c0_53, %c0_54] : memref<18x18x128xf32, #tpu.memory_space<vmem>>, vector<8x16x128xf32>
    %c0_55 = arith.constant 0 : index
    %c0_56 = arith.constant 0 : index
    %c0_57 = arith.constant 0 : index
    %74 = vector.load %arg5[%c0_55, %c0_56, %c0_57] : memref<3x3x128xf32, #tpu.memory_space<vmem>>, vector<1x1x128xf32>
    %75 = vector.shape_cast %74 : vector<1x1x128xf32> to vector<128xf32>
    %76 = vector.shape_cast %75 : vector<128xf32> to vector<1x1x128xf32>
    %77 = vector.broadcast %76 : vector<1x1x128xf32> to vector<8x16x128xf32>
    %78 = arith.mulf %73, %77 : vector<8x16x128xf32>
    %79 = arith.addf %72, %78 : vector<8x16x128xf32>
    %c0_58 = arith.constant 0 : index
    %c1_59 = arith.constant 1 : index
    %c0_60 = arith.constant 0 : index
    %80 = vector.load %arg8[%c0_58, %c1_59, %c0_60] : memref<18x18x128xf32, #tpu.memory_space<vmem>>, vector<8x16x128xf32>
    %c0_61 = arith.constant 0 : index
    %c1_62 = arith.constant 1 : index
    %c0_63 = arith.constant 0 : index
    %81 = vector.load %arg5[%c0_61, %c1_62, %c0_63] : memref<3x3x128xf32, #tpu.memory_space<vmem>>, vector<1x1x128xf32>
    %82 = vector.shape_cast %81 : vector<1x1x128xf32> to vector<128xf32>
    %83 = vector.shape_cast %82 : vector<128xf32> to vector<1x1x128xf32>
    %84 = vector.broadcast %83 : vector<1x1x128xf32> to vector<8x16x128xf32>
    %85 = arith.mulf %80, %84 : vector<8x16x128xf32>
    %86 = arith.addf %79, %85 : vector<8x16x128xf32>
    %c0_64 = arith.constant 0 : index
    %c2 = arith.constant 2 : index
    %c0_65 = arith.constant 0 : index
    %87 = vector.load %arg8[%c0_64, %c2, %c0_65] : memref<18x18x128xf32, #tpu.memory_space<vmem>>, vector<8x16x128xf32>
    %c0_66 = arith.constant 0 : index
    %c2_67 = arith.constant 2 : index
    %c0_68 = arith.constant 0 : index
    %88 = vector.load %arg5[%c0_66, %c2_67, %c0_68] : memref<3x3x128xf32, #tpu.memory_space<vmem>>, vector<1x1x128xf32>
    %89 = vector.shape_cast %88 : vector<1x1x128xf32> to vector<128xf32>
    %90 = vector.shape_cast %89 : vector<128xf32> to vector<1x1x128xf32>
    %91 = vector.broadcast %90 : vector<1x1x128xf32> to vector<8x16x128xf32>
    %92 = arith.mulf %87, %91 : vector<8x16x128xf32>
    %93 = arith.addf %86, %92 : vector<8x16x128xf32>
    %c1_69 = arith.constant 1 : index
    %c0_70 = arith.constant 0 : index
    %c0_71 = arith.constant 0 : index
    %94 = vector.load %arg8[%c1_69, %c0_70, %c0_71] : memref<18x18x128xf32, #tpu.memory_space<vmem>>, vector<8x16x128xf32>
    %c1_72 = arith.constant 1 : index
    %c0_73 = arith.constant 0 : index
    %c0_74 = arith.constant 0 : index
    %95 = vector.load %arg5[%c1_72, %c0_73, %c0_74] : memref<3x3x128xf32, #tpu.memory_space<vmem>>, vector<1x1x128xf32>
    %96 = vector.shape_cast %95 : vector<1x1x128xf32> to vector<128xf32>
    %97 = vector.shape_cast %96 : vector<128xf32> to vector<1x1x128xf32>
    %98 = vector.broadcast %97 : vector<1x1x128xf32> to vector<8x16x128xf32>
    %99 = arith.mulf %94, %98 : vector<8x16x128xf32>
    %100 = arith.addf %93, %99 : vector<8x16x128xf32>
    %c1_75 = arith.constant 1 : index
    %c1_76 = arith.constant 1 : index
    %c0_77 = arith.constant 0 : index
    %101 = vector.load %arg8[%c1_75, %c1_76, %c0_77] : memref<18x18x128xf32, #tpu.memory_space<vmem>>, vector<8x16x128xf32>
    %c1_78 = arith.constant 1 : index
    %c1_79 = arith.constant 1 : index
    %c0_80 = arith.constant 0 : index
    %102 = vector.load %arg5[%c1_78, %c1_79, %c0_80] : memref<3x3x128xf32, #tpu.memory_space<vmem>>, vector<1x1x128xf32>
    %103 = vector.shape_cast %102 : vector<1x1x128xf32> to vector<128xf32>
    %104 = vector.shape_cast %103 : vector<128xf32> to vector<1x1x128xf32>
    %105 = vector.broadcast %104 : vector<1x1x128xf32> to vector<8x16x128xf32>
    %106 = arith.mulf %101, %105 : vector<8x16x128xf32>
    %107 = arith.addf %100, %106 : vector<8x16x128xf32>
    %c1_81 = arith.constant 1 : index
    %c2_82 = arith.constant 2 : index
    %c0_83 = arith.constant 0 : index
    %108 = vector.load %arg8[%c1_81, %c2_82, %c0_83] : memref<18x18x128xf32, #tpu.memory_space<vmem>>, vector<8x16x128xf32>
    %c1_84 = arith.constant 1 : index
    %c2_85 = arith.constant 2 : index
    %c0_86 = arith.constant 0 : index
    %109 = vector.load %arg5[%c1_84, %c2_85, %c0_86] : memref<3x3x128xf32, #tpu.memory_space<vmem>>, vector<1x1x128xf32>
    %110 = vector.shape_cast %109 : vector<1x1x128xf32> to vector<128xf32>
    %111 = vector.shape_cast %110 : vector<128xf32> to vector<1x1x128xf32>
    %112 = vector.broadcast %111 : vector<1x1x128xf32> to vector<8x16x128xf32>
    %113 = arith.mulf %108, %112 : vector<8x16x128xf32>
    %114 = arith.addf %107, %113 : vector<8x16x128xf32>
    %c2_87 = arith.constant 2 : index
    %c0_88 = arith.constant 0 : index
    %c0_89 = arith.constant 0 : index
    %115 = vector.load %arg8[%c2_87, %c0_88, %c0_89] : memref<18x18x128xf32, #tpu.memory_space<vmem>>, vector<8x16x128xf32>
    %c2_90 = arith.constant 2 : index
    %c0_91 = arith.constant 0 : index
    %c0_92 = arith.constant 0 : index
    %116 = vector.load %arg5[%c2_90, %c0_91, %c0_92] : memref<3x3x128xf32, #tpu.memory_space<vmem>>, vector<1x1x128xf32>
    %117 = vector.shape_cast %116 : vector<1x1x128xf32> to vector<128xf32>
    %118 = vector.shape_cast %117 : vector<128xf32> to vector<1x1x128xf32>
    %119 = vector.broadcast %118 : vector<1x1x128xf32> to vector<8x16x128xf32>
    %120 = arith.mulf %115, %119 : vector<8x16x128xf32>
    %121 = arith.addf %114, %120 : vector<8x16x128xf32>
    %c2_93 = arith.constant 2 : index
    %c1_94 = arith.constant 1 : index
    %c0_95 = arith.constant 0 : index
    %122 = vector.load %arg8[%c2_93, %c1_94, %c0_95] : memref<18x18x128xf32, #tpu.memory_space<vmem>>, vector<8x16x128xf32>
    %c2_96 = arith.constant 2 : index
    %c1_97 = arith.constant 1 : index
    %c0_98 = arith.constant 0 : index
    %123 = vector.load %arg5[%c2_96, %c1_97, %c0_98] : memref<3x3x128xf32, #tpu.memory_space<vmem>>, vector<1x1x128xf32>
    %124 = vector.shape_cast %123 : vector<1x1x128xf32> to vector<128xf32>
    %125 = vector.shape_cast %124 : vector<128xf32> to vector<1x1x128xf32>
    %126 = vector.broadcast %125 : vector<1x1x128xf32> to vector<8x16x128xf32>
    %127 = arith.mulf %122, %126 : vector<8x16x128xf32>
    %128 = arith.addf %121, %127 : vector<8x16x128xf32>
    %c2_99 = arith.constant 2 : index
    %c2_100 = arith.constant 2 : index
    %c0_101 = arith.constant 0 : index
    %129 = vector.load %arg8[%c2_99, %c2_100, %c0_101] : memref<18x18x128xf32, #tpu.memory_space<vmem>>, vector<8x16x128xf32>
    %c2_102 = arith.constant 2 : index
    %c2_103 = arith.constant 2 : index
    %c0_104 = arith.constant 0 : index
    %130 = vector.load %arg5[%c2_102, %c2_103, %c0_104] : memref<3x3x128xf32, #tpu.memory_space<vmem>>, vector<1x1x128xf32>
    %131 = vector.shape_cast %130 : vector<1x1x128xf32> to vector<128xf32>
    %132 = vector.shape_cast %131 : vector<128xf32> to vector<1x1x128xf32>
    %133 = vector.broadcast %132 : vector<1x1x128xf32> to vector<8x16x128xf32>
    %134 = arith.mulf %129, %133 : vector<8x16x128xf32>
    %135 = arith.addf %128, %134 : vector<8x16x128xf32>
    %136 = vector.shape_cast %4 : vector<1x128xf32> to vector<1x1x128xf32>
    %137 = vector.broadcast %136 : vector<1x1x128xf32> to vector<8x16x128xf32>
    %138 = arith.addf %135, %137 : vector<8x16x128xf32>
    %cst_105 = arith.constant 0.000000e+00 : f32
    %139 = vector.broadcast %cst_105 : f32 to vector<8x16x128xf32>
    %140 = arith.maximumf %138, %139 : vector<8x16x128xf32>
    %c0_106 = arith.constant 0 : index
    %c0_107 = arith.constant 0 : index
    %c0_108 = arith.constant 0 : index
    %c128 = arith.constant 128 : index
    %141 = vector.load %arg7[%c0_106, %c0_107, %c0_108, %c128] : memref<1x16x16x256xf32, #tpu.memory_space<vmem>>, vector<1x8x16x128xf32>
    %142 = vector.shape_cast %141 : vector<1x8x16x128xf32> to vector<8x16x128xf32>
    %143 = vector.shape_cast %140 : vector<8x16x128xf32> to vector<1x8x16x128xf32>
    tpu.vector_store %arg7[%c0_106, %c0_107, %c0_108, %c128], %143 {strides = array<i32>} : memref<1x16x16x256xf32, #tpu.memory_space<vmem>>, vector<1x8x16x128xf32>,
    %cst_109 = arith.constant 0.000000e+00 : f32
    %144 = vector.broadcast %cst_109 : f32 to vector<8x16x128xf32>
    %c8_110 = arith.constant 8 : index
    %c0_111 = arith.constant 0 : index
    %c0_112 = arith.constant 0 : index
    %145 = vector.load %arg8[%c8_110, %c0_111, %c0_112] : memref<18x18x128xf32, #tpu.memory_space<vmem>>, vector<8x16x128xf32>
    %c0_113 = arith.constant 0 : index
    %c0_114 = arith.constant 0 : index
    %c0_115 = arith.constant 0 : index
    %146 = vector.load %arg5[%c0_113, %c0_114, %c0_115] : memref<3x3x128xf32, #tpu.memory_space<vmem>>, vector<1x1x128xf32>
    %147 = vector.shape_cast %146 : vector<1x1x128xf32> to vector<128xf32>
    %148 = vector.shape_cast %147 : vector<128xf32> to vector<1x1x128xf32>
    %149 = vector.broadcast %148 : vector<1x1x128xf32> to vector<8x16x128xf32>
    %150 = arith.mulf %145, %149 : vector<8x16x128xf32>
    %151 = arith.addf %144, %150 : vector<8x16x128xf32>
    %c8_116 = arith.constant 8 : index
    %c1_117 = arith.constant 1 : index
    %c0_118 = arith.constant 0 : index
    %152 = vector.load %arg8[%c8_116, %c1_117, %c0_118] : memref<18x18x128xf32, #tpu.memory_space<vmem>>, vector<8x16x128xf32>
    %c0_119 = arith.constant 0 : index
    %c1_120 = arith.constant 1 : index
    %c0_121 = arith.constant 0 : index
    %153 = vector.load %arg5[%c0_119, %c1_120, %c0_121] : memref<3x3x128xf32, #tpu.memory_space<vmem>>, vector<1x1x128xf32>
    %154 = vector.shape_cast %153 : vector<1x1x128xf32> to vector<128xf32>
    %155 = vector.shape_cast %154 : vector<128xf32> to vector<1x1x128xf32>
    %156 = vector.broadcast %155 : vector<1x1x128xf32> to vector<8x16x128xf32>
    %157 = arith.mulf %152, %156 : vector<8x16x128xf32>
    %158 = arith.addf %151, %157 : vector<8x16x128xf32>
    %c8_122 = arith.constant 8 : index
    %c2_123 = arith.constant 2 : index
    %c0_124 = arith.constant 0 : index
    %159 = vector.load %arg8[%c8_122, %c2_123, %c0_124] : memref<18x18x128xf32, #tpu.memory_space<vmem>>, vector<8x16x128xf32>
    %c0_125 = arith.constant 0 : index
    %c2_126 = arith.constant 2 : index
    %c0_127 = arith.constant 0 : index
    %160 = vector.load %arg5[%c0_125, %c2_126, %c0_127] : memref<3x3x128xf32, #tpu.memory_space<vmem>>, vector<1x1x128xf32>
    %161 = vector.shape_cast %160 : vector<1x1x128xf32> to vector<128xf32>
    %162 = vector.shape_cast %161 : vector<128xf32> to vector<1x1x128xf32>
    %163 = vector.broadcast %162 : vector<1x1x128xf32> to vector<8x16x128xf32>
    %164 = arith.mulf %159, %163 : vector<8x16x128xf32>
    %165 = arith.addf %158, %164 : vector<8x16x128xf32>
    %c9_128 = arith.constant 9 : index
    %c0_129 = arith.constant 0 : index
    %c0_130 = arith.constant 0 : index
    %166 = vector.load %arg8[%c9_128, %c0_129, %c0_130] : memref<18x18x128xf32, #tpu.memory_space<vmem>>, vector<8x16x128xf32>
    %c1_131 = arith.constant 1 : index
    %c0_132 = arith.constant 0 : index
    %c0_133 = arith.constant 0 : index
    %167 = vector.load %arg5[%c1_131, %c0_132, %c0_133] : memref<3x3x128xf32, #tpu.memory_space<vmem>>, vector<1x1x128xf32>
    %168 = vector.shape_cast %167 : vector<1x1x128xf32> to vector<128xf32>
    %169 = vector.shape_cast %168 : vector<128xf32> to vector<1x1x128xf32>
    %170 = vector.broadcast %169 : vector<1x1x128xf32> to vector<8x16x128xf32>
    %171 = arith.mulf %166, %170 : vector<8x16x128xf32>
    %172 = arith.addf %165, %171 : vector<8x16x128xf32>
    %c9_134 = arith.constant 9 : index
    %c1_135 = arith.constant 1 : index
    %c0_136 = arith.constant 0 : index
    %173 = vector.load %arg8[%c9_134, %c1_135, %c0_136] : memref<18x18x128xf32, #tpu.memory_space<vmem>>, vector<8x16x128xf32>
    %c1_137 = arith.constant 1 : index
    %c1_138 = arith.constant 1 : index
    %c0_139 = arith.constant 0 : index
    %174 = vector.load %arg5[%c1_137, %c1_138, %c0_139] : memref<3x3x128xf32, #tpu.memory_space<vmem>>, vector<1x1x128xf32>
    %175 = vector.shape_cast %174 : vector<1x1x128xf32> to vector<128xf32>
    %176 = vector.shape_cast %175 : vector<128xf32> to vector<1x1x128xf32>
    %177 = vector.broadcast %176 : vector<1x1x128xf32> to vector<8x16x128xf32>
    %178 = arith.mulf %173, %177 : vector<8x16x128xf32>
    %179 = arith.addf %172, %178 : vector<8x16x128xf32>
    %c9_140 = arith.constant 9 : index
    %c2_141 = arith.constant 2 : index
    %c0_142 = arith.constant 0 : index
    %180 = vector.load %arg8[%c9_140, %c2_141, %c0_142] : memref<18x18x128xf32, #tpu.memory_space<vmem>>, vector<8x16x128xf32>
    %c1_143 = arith.constant 1 : index
    %c2_144 = arith.constant 2 : index
    %c0_145 = arith.constant 0 : index
    %181 = vector.load %arg5[%c1_143, %c2_144, %c0_145] : memref<3x3x128xf32, #tpu.memory_space<vmem>>, vector<1x1x128xf32>
    %182 = vector.shape_cast %181 : vector<1x1x128xf32> to vector<128xf32>
    %183 = vector.shape_cast %182 : vector<128xf32> to vector<1x1x128xf32>
    %184 = vector.broadcast %183 : vector<1x1x128xf32> to vector<8x16x128xf32>
    %185 = arith.mulf %180, %184 : vector<8x16x128xf32>
    %186 = arith.addf %179, %185 : vector<8x16x128xf32>
    %c10 = arith.constant 10 : index
    %c0_146 = arith.constant 0 : index
    %c0_147 = arith.constant 0 : index
    %187 = vector.load %arg8[%c10, %c0_146, %c0_147] : memref<18x18x128xf32, #tpu.memory_space<vmem>>, vector<8x16x128xf32>
    %c2_148 = arith.constant 2 : index
    %c0_149 = arith.constant 0 : index
    %c0_150 = arith.constant 0 : index
    %188 = vector.load %arg5[%c2_148, %c0_149, %c0_150] : memref<3x3x128xf32, #tpu.memory_space<vmem>>, vector<1x1x128xf32>
    %189 = vector.shape_cast %188 : vector<1x1x128xf32> to vector<128xf32>
    %190 = vector.shape_cast %189 : vector<128xf32> to vector<1x1x128xf32>
    %191 = vector.broadcast %190 : vector<1x1x128xf32> to vector<8x16x128xf32>
    %192 = arith.mulf %187, %191 : vector<8x16x128xf32>
    %193 = arith.addf %186, %192 : vector<8x16x128xf32>
    %c10_151 = arith.constant 10 : index
    %c1_152 = arith.constant 1 : index
    %c0_153 = arith.constant 0 : index
    %194 = vector.load %arg8[%c10_151, %c1_152, %c0_153] : memref<18x18x128xf32, #tpu.memory_space<vmem>>, vector<8x16x128xf32>
    %c2_154 = arith.constant 2 : index
    %c1_155 = arith.constant 1 : index
    %c0_156 = arith.constant 0 : index
    %195 = vector.load %arg5[%c2_154, %c1_155, %c0_156] : memref<3x3x128xf32, #tpu.memory_space<vmem>>, vector<1x1x128xf32>
    %196 = vector.shape_cast %195 : vector<1x1x128xf32> to vector<128xf32>
    %197 = vector.shape_cast %196 : vector<128xf32> to vector<1x1x128xf32>
    %198 = vector.broadcast %197 : vector<1x1x128xf32> to vector<8x16x128xf32>
    %199 = arith.mulf %194, %198 : vector<8x16x128xf32>
    %200 = arith.addf %193, %199 : vector<8x16x128xf32>
    %c10_157 = arith.constant 10 : index
    %c2_158 = arith.constant 2 : index
    %c0_159 = arith.constant 0 : index
    %201 = vector.load %arg8[%c10_157, %c2_158, %c0_159] : memref<18x18x128xf32, #tpu.memory_space<vmem>>, vector<8x16x128xf32>
    %c2_160 = arith.constant 2 : index
    %c2_161 = arith.constant 2 : index
    %c0_162 = arith.constant 0 : index
    %202 = vector.load %arg5[%c2_160, %c2_161, %c0_162] : memref<3x3x128xf32, #tpu.memory_space<vmem>>, vector<1x1x128xf32>
    %203 = vector.shape_cast %202 : vector<1x1x128xf32> to vector<128xf32>
    %204 = vector.shape_cast %203 : vector<128xf32> to vector<1x1x128xf32>
    %205 = vector.broadcast %204 : vector<1x1x128xf32> to vector<8x16x128xf32>
    %206 = arith.mulf %201, %205 : vector<8x16x128xf32>
    %207 = arith.addf %200, %206 : vector<8x16x128xf32>
    %208 = vector.shape_cast %4 : vector<1x128xf32> to vector<1x1x128xf32>
    %209 = vector.broadcast %208 : vector<1x1x128xf32> to vector<8x16x128xf32>
    %210 = arith.addf %207, %209 : vector<8x16x128xf32>
    %cst_163 = arith.constant 0.000000e+00 : f32
    %211 = vector.broadcast %cst_163 : f32 to vector<8x16x128xf32>
    %212 = arith.maximumf %210, %211 : vector<8x16x128xf32>
    %c0_164 = arith.constant 0 : index
    %c8_165 = arith.constant 8 : index
    %c0_166 = arith.constant 0 : index
    %c128_167 = arith.constant 128 : index
    %213 = vector.load %arg7[%c0_164, %c8_165, %c0_166, %c128_167] : memref<1x16x16x256xf32, #tpu.memory_space<vmem>>, vector<1x8x16x128xf32>
    %214 = vector.shape_cast %213 : vector<1x8x16x128xf32> to vector<8x16x128xf32>
    %215 = vector.shape_cast %212 : vector<8x16x128xf32> to vector<1x8x16x128xf32>
    tpu.vector_store %arg7[%c0_164, %c8_165, %c0_166, %c128_167], %215 {strides = array<i32>} : memref<1x16x16x256xf32, #tpu.memory_space<vmem>>, vector<1x8x16x128xf32>,
    return
  }
  func.func @transform_0(%arg0: i32, %arg1: i32) -> (i32, i32, i32, i32) {
    %c0_i32 = arith.constant 0 : i32
    %c0_i32_0 = arith.constant 0 : i32
    %c0_i32_1 = arith.constant 0 : i32
    %c0_i32_2 = arith.constant 0 : i32
    return %arg0, %c0_i32, %c0_i32_0, %c0_i32_1 : i32, i32, i32, i32
  }
  func.func @transform_1(%arg0: i32, %arg1: i32) -> (i32, i32) {
    %c0_i32 = arith.constant 0 : i32
    %c0_i32_0 = arith.constant 0 : i32
    %c0_i32_1 = arith.constant 0 : i32
    return %c0_i32, %c0_i32_0 : i32, i32
  }
  func.func @transform_2(%arg0: i32, %arg1: i32) -> (i32, i32) {
    %c0_i32 = arith.constant 0 : i32
    %c0_i32_0 = arith.constant 0 : i32
    %c0_i32_1 = arith.constant 0 : i32
    return %c0_i32, %c0_i32_0 : i32, i32
  }
  func.func @transform_3(%arg0: i32, %arg1: i32) -> (i32, i32, i32) {
    %c0_i32 = arith.constant 0 : i32
    %c0_i32_0 = arith.constant 0 : i32
    %c0_i32_1 = arith.constant 0 : i32
    %c0_i32_2 = arith.constant 0 : i32
    return %c0_i32, %c0_i32_0, %c0_i32_1 : i32, i32, i32
  }
  func.func @transform_4(%arg0: i32, %arg1: i32) -> (i32, i32) {
    %c0_i32 = arith.constant 0 : i32
    %c0_i32_0 = arith.constant 0 : i32
    %c0_i32_1 = arith.constant 0 : i32
    return %c0_i32, %c0_i32_0 : i32, i32
  }
  func.func @transform_5(%arg0: i32, %arg1: i32) -> (i32, i32, i32, i32) {
    %c0_i32 = arith.constant 0 : i32
    %c0_i32_0 = arith.constant 0 : i32
    %c0_i32_1 = arith.constant 0 : i32
    return %arg0, %arg1, %c0_i32, %c0_i32_0 : i32, i32, i32, i32
  }
}

</mosaic_0001>

<bundles_post_ra>
// kernel: tpu_custom_call.1
= control target key start
LH: loop header
LB: loop body
LE: loop exit
PB: predicated region body
PF: predicated region fallthrough
CT: control target
= control target key end

     0   :  { %10 = vsyncpa [#allocation4], 0  ;;  %s3573_s0 = inlined_call_operand.vmem [shape: f32[2,16,16,4], index: 0, kind: input, shape index: {}]   ;;  %s3574_s1 = inlined_call_operand.vmem [shape: f32[4,128], index: 1, kind: input, shape index: {}]   ;;  %s3575_s2 = inlined_call_operand.vmem [shape: f32[1,128], index: 2, kind: input, shape index: {}]   ;;  %s3576_s3 = inlined_call_operand.vmem [shape: f32[3,3,128], index: 3, kind: input, shape index: {}]   ;;  %s3577_s4 = inlined_call_operand.vmem [shape: f32[1,128], index: 4, kind: input, shape index: {}]   ;;  %s3578_s5 = inlined_call_operand.hbm [shape: f32[2,16,16,256], index: 5, kind: output, shape index: {}]  }
   0x1   :  { %12 = vsyncpa [#allocation4 + $0x1], 0  ;;  %s2188_s18 = smov 0   ;;  %s2190_s19 = smov 0  }
   0x2   :  { %s2192_s20 = smov 0   ;;  %s2194_s21 = smov 0  }
   0x3   :  { %s2196_s22 = smov 0   ;;  %s2198_s23 = smov 0  }
   0x4 LB: > { %s1847_s24 = sadd.s32 4294967295, %s2153_s23   ;;  %s1848_s25 = sadd.s32 4294967294, %s2153_s23   ;;  %s2153_s23 = sphi %s2198_s23, %s18_s23   ;;  %s2149_s22 = sphi %s2196_s22, %s3755_s22   ;;  %s2145_s21 = sphi %s2194_s21, %s3754_s21   ;;  %s2141_s20 = sphi %s2192_s20, %s3753_s20   ;;  %s2137_s19 = sphi %s2190_s19, %s3752_s19   ;;  %s2133_s18 = sphi %s2188_s18, %s3751_s18  }
   0x5   : > { %s30_s26 = sadd.s32 1, %s2149_s22  ;;  %s149_s27 = sadd.s32 1, %s2141_s20 }
   0x6   : > { %p32_p0 = scmp.ge.s32.totalorder %s30_s26, 2  ;;  %p159_p1 = scmp.ne.s32.totalorder %s2141_s20, %s2137_s19 }
   0x7   : > { %p160_p2 = scmp.eq.s32.totalorder %s1847_s24, 1  ;;  %p165_p3 = scmp.ne.s32.totalorder %s2137_s19, %s2133_s18 }
   0x8   : > { %s3757_s26 = smov (%p32_p0, %s30_s26), 0  ;;  %p166_p5 = scmp.eq.s32.totalorder %s1848_s25, 1 }
   0x9   : > { %p2228_p4 = por %p160_p2, %p159_p1  ;;  %s144_s29 = ssub.s32 %s2149_s22, %s3757_s26 }
   0xa   : > { %p1851_p6 = scmp.ge.s32.totalorder %s2153_s23, 1  ;;  %p147_p7 = scmp.eq.s32.totalorder %s144_s29, 0 }
   0xb   : > { %p2235_p8 = por %p166_p5, %p165_p3  ;;  %p204_p9 = scmp.lt.s32.totalorder %s2153_s23, 3 }
   0xc   : > { %s2241_s6 = scalar_select %p147_p7, %s2141_s20, %s149_s27  }
   0xd   : > { %p205_p10 = pnand %p1851_p6, %p204_p9 }
   0xf   : > { %208 = sbr.rel (%p205_p10) target bundleno = 398 (0x18e), region = 40 }
  0x14   : > { %v239_v0 = vld [vmem:[%s3574_s1] sm:$0xf]  ;;  %vm348_vm0 = vcmask 1043456   ;;  %p232_p11 = scmp.lt.s32.totalorder %s2145_s21, 1  ;;  %vm299_vm1 = vcmask 31744   ;;  %v2155_v21 = vmov 0.0  }
  0x15   : > { %1855 = vmatpush.msk.msra.mxu0 %vm348_vm0, %v239_v0  ;;  %1964 = vmatpush.msk.msra.mxu2 %vm348_vm0, %v239_v0  ;;  %243 = vst [vmem:[#allocation2 + $0x18] sm:$0x1] %v2155_v21  ;;  %v2368_v34 = vld [vmem:[%s3575_s2] ss:$0 sm:$0xff]  ;;  %s229_s16 = sand.u32 1, %s2137_s19   ;;  %s1963_s15 = sshll.u32 %s2145_s21, 9 }
  0x16   : > { %1888 = vmatpush.msk.msra.mxu1 %vm348_vm0, %v239_v0  ;;  %1965 = vmatpush.msk.msra.mxu3 %vm348_vm0, %v239_v0  ;;  %s233_s9 = scalar_select %p232_p11, %s2145_s21, 1  ;;  %242 = vst [vmem:[#allocation2] sm:$0x1] %v2155_v21  ;;  %v2390_v57 = vld [vmem:[%s3576_s3] ss:$0 sm:$0xff] }
  0x17   : > { %1921 = vmatpush.msk.msrb.mxu2 %vm348_vm0, %v239_v0  ;;  %244 = vst [vmem:[#allocation2 + $0x30] sm:$0x1] %v2155_v21  ;;  %s1852_s17 = sshll.u32 %s229_s16, 9  ;;  %v2395_v58 = vld [vmem:[%s3576_s3 + $0x1] ss:$0 sm:$0xff]  ;;  %s1760_s27 = scalar_lea.hbm %s3578_s5, %s1963_s15 }
  0x18   : > { %1926 = vmatpush.msk.msrb.mxu3 %vm348_vm0, %v239_v0  ;;  %s1962_s10 = sshll.u32 %s233_s9, 8  ;;  %245 = vst [vmem:[#allocation2 + $0x48] sm:$0x1] %v2155_v21  ;;  %s2375_s24 = scalar_lea.vmem [#allocation3], %s1852_s17  ;;  %v2400_v59 = vld [vmem:[%s3576_s3 + $0x5] ss:$0 sm:$0xff] }
  0x19   : > { %s2251_s13 = scalar_lea.vmem %s3573_s0, %s1962_s10  ;;  %246 = vst [vmem:[#allocation2 + $0x60] sm:$0x1] %v2155_v21  ;;  %v2405_v60 = vld [vmem:[%s3576_s3 + $0x9] ss:$0 sm:$0xff]  ;;  %s1761_s21 = sshll.u32 %s2375_s24, 4  ;;  %s1762_s21 = int_to_ptr.vmem [resolvable:$true] %s1761_s21 }
  0x1a   : > { %v2254_v1 = vld [vmem:[%s2251_s13] sm:$0xff]  ;;  %v289_v2 = vld [vmem:[%s2251_s13 + $0x48] sm:$0xff]  ;;  %v290_v6 = vld [vmem:[%s2251_s13 + $0x50] sm:$0xff]  ;;  %247 = vst [vmem:[#allocation2 + $0x78] sm:$0x1] %v2155_v21  ;;  %s1763_s29 = sshll.u32 %s1760_s27, 4  ;;  %s1764_s29 = int_to_ptr.hbm [resolvable:$true] %s1763_s29 }
  0x1b   : > { %v1872_v3 = vld [vmem:[%s2251_s13 + $0x80] sm:$0xff]  ;;  %1856 = vmatmul.msk.f32.vlgmr.msra.gmra.mxu0 %vm299_vm1, %v2254_v1  ;;  %1865 = vmatmul.msk.f32.vlgmr.msra.gmra.mxu2 %vm299_vm1, %v289_v2  ;;  %v1881_v4 = vld [vmem:[%s2251_s13 + $0xc8] sm:$0xff]  ;;  %v1882_v8 = vld [vmem:[%s2251_s13 + $0xd0] sm:$0xff]  ;;  %248 = vst [vmem:[#allocation2 + $0x90] sm:$0x1] %v2155_v21  ;;  %s1746_s7 = scalar_lea.sflag [#allocation4], %s229_s16 }
  0x1c   : > { %1889 = vmatmul.msk.f32.vlgmr.msra.gmra.mxu1 %vm299_vm1, %v1872_v3  ;;  %1898 = vmatmul.msk.f32.vlgmr.msra.gmra.mxu3 %vm299_vm1, %v1881_v4  ;;  %v2265_v5 = vld [vmem:[%s2251_s13 + $0x8] sm:$0xff]  ;;  %v282_v9 = vld [vmem:[%s2251_s13 + $0x10] sm:$0xff]  ;;  %v291_v10 = vld [vmem:[%s2251_s13 + $0x58] sm:$0xff]  ;;  %249 = vst [vmem:[#allocation2 + $0xa8] sm:$0x1] %v2155_v21  ;;  %s2089_s8 = sshra.s32 %s1764_s29, 4  ;;  %s2090_s8 = int_to_ptr.hbm [resolvable:$true] %s2089_s8 }
  0x1d   : > { %v1873_v7 = vld [vmem:[%s2251_s13 + $0x88] sm:$0xff]  ;;  %v1874_v11 = vld [vmem:[%s2251_s13 + $0x90] sm:$0xff]  ;;  %v1883_v12 = vld [vmem:[%s2251_s13 + $0xd8] sm:$0xff]  ;;  %250 = vst [vmem:[#allocation2 + $0xc0] sm:$0x1] %v2155_v21  ;;  %s2091_s9 = scalar_lea.hbm %s2090_s8, 512  ;;  %p2096_p1 = scmp.lt.s32.totalorder %s2090_s8, %s3578_s5 }
  0x1e   : > { %v283_v13 = vld [vmem:[%s2251_s13 + $0x18] sm:$0xff]  ;;  %v292_v14 = vld [vmem:[%s2251_s13 + $0x60] sm:$0xff]  ;;  %v293_v18 = vld [vmem:[%s2251_s13 + $0x68] sm:$0xff]  ;;  %251 = vst [vmem:[#allocation2 + $0xd8] sm:$0x1] %v2155_v21  ;;  %p2092_p12 = scmp.ne.s32.totalorder %s2090_s8, %s2091_s9  ;;  %s2095_s12 = scalar_lea.hbm %s3578_s5, 1024 }
  0x1f   : > { %v1875_v15 = vld [vmem:[%s2251_s13 + $0x98] sm:$0xff]  ;;  %v1884_v16 = vld [vmem:[%s2251_s13 + $0xe0] sm:$0xff]  ;;  %v1885_v20 = vld [vmem:[%s2251_s13 + $0xe8] sm:$0xff]  ;;  %252 = vst [vmem:[#allocation2 + $0xf0] sm:$0x1] %v2155_v21  ;;  %p2097_p2 = scmp.lt.s32.totalorder %s2095_s12, %s2091_s9 }
  0x20   : > { %v284_v17 = vld [vmem:[%s2251_s13 + $0x20] sm:$0xff]  ;;  %v285_v22 = vld [vmem:[%s2251_s13 + $0x28] sm:$0xff]  ;;  %v294_v23 = vld [vmem:[%s2251_s13 + $0x70] sm:$0xff]  ;;  %253 = vst [vmem:[#allocation2 + $0x108] sm:$0x1] %v2155_v21  ;;  %p2093_p13 = pnand %p2092_p12, %p2228_p4 }
  0x21   : > { %v1876_v19 = vld [vmem:[%s2251_s13 + $0xa0] sm:$0xff]  ;;  %v1877_v24 = vld [vmem:[%s2251_s13 + $0xa8] sm:$0xff]  ;;  %v1886_v25 = vld [vmem:[%s2251_s13 + $0xf0] sm:$0xff]  ;;  %254 = vst [vmem:[#allocation2 + $0x120] sm:$0x1] %v2155_v21  ;;  %p2098_p3 = por %p2097_p2, %p2096_p1 }
  0x22   : > { %v286_v26 = vld [vmem:[%s2251_s13 + $0x30] sm:$0xff]  ;;  %v295_v27 = vld [vmem:[%s2251_s13 + $0x78] sm:$0xff]  ;;  %255 = vst [vmem:[#allocation2 + $0x138] sm:$0x1] %v2155_v21  ;;  %v288_v32 = vld [vmem:[%s2251_s13 + $0x40] sm:$0xff]  ;;  %p2094_p0 = pneg %p2093_p13 }
  0x23   : > { %1857 = vmatmul.msk.f32.gmra.mxu0 %vm299_vm1, %v2265_v5  ;;  %1866 = vmatmul.msk.f32.gmra.mxu2 %vm299_vm1, %v290_v6  ;;  %v1878_v28 = vld [vmem:[%s2251_s13 + $0xb0] sm:$0xff]  ;;  %v1887_v29 = vld [vmem:[%s2251_s13 + $0xf8] sm:$0xff]  ;;  %256 = vst [vmem:[#allocation2 + $0x150] sm:$0x1] %v2155_v21  ;;  %v1880_v33 = vld [vmem:[%s2251_s13 + $0xc0] sm:$0xff] }
  0x24   : > { %1890 = vmatmul.msk.f32.gmra.mxu1 %vm299_vm1, %v1873_v7  ;;  %1899 = vmatmul.msk.f32.gmra.mxu3 %vm299_vm1, %v1882_v8  ;;  %257 = vst [vmem:[#allocation2 + $0x168] sm:$0x1] %v2155_v21  ;;  %v287_v30 = vld [vmem:[%s2251_s13 + $0x38] sm:$0xff]  ;;  %v2413_v2 = vld [vmem:[%s3576_s3] ss:$0 sm:$0xff]  ;;  %p2099_p5 = pnand %p2098_p3, %p2094_p0 }
  0x25   : > { %258 = vst [vmem:[#allocation2 + $0x180] sm:$0x1] %v2155_v21  ;;  %v1879_v31 = vld [vmem:[%s2251_s13 + $0xb8] sm:$0xff]  ;;  %v2418_v3 = vld [vmem:[%s3576_s3 + $0x1] ss:$0 sm:$0xff] }
  0x26   : > { %259 = vst [vmem:[#allocation2 + $0x198] sm:$0x1] %v2155_v21  ;;  %v2424_v6 = vld [vmem:[%s3576_s3 + $0x5] ss:$0 sm:$0xff]  ;;  %v2430_v8 = vld [vmem:[%s3576_s3 + $0x9] ss:$0 sm:$0xff] }
  0x27   : > { %260 = vst [vmem:[#allocation2 + $0x11] sm:$0x1] %v2155_v21 }
  0x28   : > { %261 = vst [vmem:[#allocation2 + $0x29] sm:$0x1] %v2155_v21 }
  0x29   : > { %262 = vst [vmem:[#allocation2 + $0x41] sm:$0x1] %v2155_v21 }
  0x2a   : > { %263 = vst [vmem:[#allocation2 + $0x59] sm:$0x1] %v2155_v21 }
  0x2b   : > { %1858 = vmatmul.msk.f32.gmra.mxu0 %vm299_vm1, %v282_v9  ;;  %1867 = vmatmul.msk.f32.gmra.mxu2 %vm299_vm1, %v291_v10  ;;  %264 = vst [vmem:[#allocation2 + $0x71] sm:$0x1] %v2155_v21 }
  0x2c   : > { %1891 = vmatmul.msk.f32.gmra.mxu1 %vm299_vm1, %v1874_v11  ;;  %1900 = vmatmul.msk.f32.gmra.mxu3 %vm299_vm1, %v1883_v12  ;;  %265 = vst [vmem:[#allocation2 + $0x89] sm:$0x1] %v2155_v21  ;;  %v2440_v12 = vld [vmem:[%s3576_s3 + $0x8] ss:$0 sm:$0xff] }
  0x2d   : > { %266 = vst [vmem:[#allocation2 + $0xa1] sm:$0x1] %v2155_v21 }
  0x2e   : > { %267 = vst [vmem:[#allocation2 + $0xb9] sm:$0x1] %v2155_v21 }
  0x2f   : > { %268 = vst [vmem:[#allocation2 + $0xd1] sm:$0x1] %v2155_v21 }
  0x30   : > { %269 = vst [vmem:[#allocation2 + $0xe9] sm:$0x1] %v2155_v21 }
  0x31   : > { %270 = vst [vmem:[#allocation2 + $0x101] sm:$0x1] %v2155_v21 }
  0x32   : > { %271 = vst [vmem:[#allocation2 + $0x119] sm:$0x1] %v2155_v21 }
  0x33   : > { %1859 = vmatmul.msk.f32.gmra.mxu0 %vm299_vm1, %v283_v13  ;;  %1868 = vmatmul.msk.f32.gmra.mxu2 %vm299_vm1, %v292_v14  ;;  %272 = vst [vmem:[#allocation2 + $0x131] sm:$0x1] %v2155_v21 }
  0x34   : > { %1892 = vmatmul.msk.f32.gmra.mxu1 %vm299_vm1, %v1875_v15  ;;  %1901 = vmatmul.msk.f32.gmra.mxu3 %vm299_vm1, %v1884_v16  ;;  %273 = vst [vmem:[#allocation2 + $0x149] sm:$0x1] %v2155_v21  ;;  %v2450_v16 = vld [vmem:[%s3576_s3 + $0x4] ss:$0 sm:$0xff] }
  0x35   : > { %274 = vst [vmem:[#allocation2 + $0x161] sm:$0x1] %v2155_v21 }
  0x36   : > { %275 = vst [vmem:[#allocation2 + $0x179] sm:$0x1] %v2155_v21 }
  0x37   : > { %276 = vst [vmem:[#allocation2 + $0x191] sm:$0x1] %v2155_v21 }
  0x38   : > { %277 = vst [vmem:[#allocation2 + $0x1a9] sm:$0x1] %v2155_v21 }
  0x39   : > { %3590 = vst [vmem:[#allocation6_spill] sm:$0xff] %v2418_v3 }
  0x3a   : > { %3591 = vst [vmem:[#allocation7_spill] sm:$0xff] %v2424_v6 }
  0x3b   : > { %1860 = vmatmul.msk.f32.gmra.mxu0 %vm299_vm1, %v284_v17  ;;  %1869 = vmatmul.msk.f32.gmra.mxu2 %vm299_vm1, %v293_v18 }
  0x3c   : > { %1893 = vmatmul.msk.f32.gmra.mxu1 %vm299_vm1, %v1876_v19  ;;  %1902 = vmatmul.msk.f32.gmra.mxu3 %vm299_vm1, %v1885_v20  ;;  %v2463_v20 = vld [vmem:[%s3576_s3 + $0x2] ss:$0 sm:$0xff] }
  0x43   : > { %1861 = vmatmul.msk.f32.gmra.mxu0 %vm299_vm1, %v285_v22  ;;  %1870 = vmatmul.msk.f32.gmra.mxu2 %vm299_vm1, %v294_v23 }
  0x44   : > { %1894 = vmatmul.msk.f32.gmra.mxu1 %vm299_vm1, %v1877_v24  ;;  %1903 = vmatmul.msk.f32.gmra.mxu3 %vm299_vm1, %v1886_v25  ;;  %v2476_v24 = vld [vmem:[%s3576_s3 + $0x6] ss:$0 sm:$0xff] }
  0x4b   : > { %1862 = vmatmul.msk.f32.gmra.mxu0 %vm299_vm1, %v286_v26  ;;  %1871 = vmatmul.msk.f32.gmra.mxu2 %vm299_vm1, %v295_v27 }
  0x4c   : > { %1895 = vmatmul.msk.f32.gmra.mxu1 %vm299_vm1, %v1878_v28  ;;  %1904 = vmatmul.msk.f32.gmra.mxu3 %vm299_vm1, %v1887_v29 }
  0x53   : > { %1863 = vmatmul.msk.f32.gmra.mxu0 %vm299_vm1, %v287_v30  ;;  %1922 = vmatmul.msk.f32.vlgmr.msrb.gmra.mxu2 %vm299_vm1, %v2254_v1 }
  0x54   : > { %1896 = vmatmul.msk.f32.gmra.mxu1 %vm299_vm1, %v1879_v31  ;;  %1927 = vmatmul.msk.f32.vlgmr.msrb.gmra.mxu3 %vm299_vm1, %v1886_v25  ;;  %v2481_v25 = vld [vmem:[%s3576_s3 + $0xa] ss:$0 sm:$0xff] }
  0x55   : > { %3597 = vst [vmem:[#allocation13_spill] sm:$0xff] %v2481_v25 }
  0x5b   : > { %1864 = vmatmul.msk.f32.gmra.mxu0 %vm299_vm1, %v288_v32  ;;  %1923 = vmatmul.msk.f32.gmra.mxu2 %vm299_vm1, %v2265_v5 }
  0x5c   : > { %1897 = vmatmul.msk.f32.gmra.mxu1 %vm299_vm1, %v1880_v33  ;;  %1928 = vmatmul.msk.f32.gmra.mxu3 %vm299_vm1, %v1887_v29 }
  0x98   : > { %v369_v35 = vpop.f32.mrf.mxu0 }
  0x99   : > { %v370_v36 = vadd.f32 %v2368_v34, %v369_v35  ;;  %v550_v37 = vpop.f32.mrf.mxu1 }
  0x9a   : > { %v551_v38 = vadd.f32 %v2368_v34, %v550_v37 }
  0x9b   : > { %v417_v39 = vmax.f32 %v370_v36, 0.0 }
  0x9c   : > { %v598_v40 = vmax.f32 %v551_v38, 0.0 }
  0x9d   : > { %433 = vst [vmem:[%s2375_s24] sm:$0xff] %v417_v39  ;;  %v811_v11 = vmul.f32 %v2395_v58, %v417_v39 }
  0x9e   : > { %450 = vst [vmem:[#allocation2 + $0x19] sm:$0xff] %v417_v39  ;;  %v396_v41 = vpop.f32.mrf.mxu2  ;;  %v2443_v13 = vmul.f32 %v2405_v60, %v598_v40  ;;  %v1316_v15 = vmul.f32 %v2418_v3, %v598_v40  ;;  %v2455_v18 = vmul.f32 %v2424_v6, %v598_v40 }
  0x9f   : > { %1905 = vst [vmem:[%s2375_s24 + $0x100] sm:$0xff] %v598_v40  ;;  %v397_v42 = vadd.f32 %v2368_v34, %v396_v41  ;;  %v577_v43 = vpop.f32.mrf.mxu3  ;;  %v2512_v41 = vld [vmem:[%s3576_s3 + $0xa] ss:$0 sm:$0xff] }
  0xa0   : > { %632 = vst [vmem:[#allocation2 + $0xd9] sm:$0xff] %v598_v40  ;;  %v578_v44 = vadd.f32 %v2368_v34, %v577_v43  ;;  %v372_v45 = vpop.f32.mrf.mxu0 }
  0xa1   : > { %v426_v46 = vmax.f32 %v397_v42, 0.0  ;;  %v373_v47 = vadd.f32 %v2368_v34, %v372_v45  ;;  %v553_v48 = vpop.f32.mrf.mxu1  ;;  %3592 = vst [vmem:[#allocation8_spill] sm:$0xff] %v2443_v13  ;;  %v2519_v45 = vld [vmem:[%s3576_s3 + $0x2] ss:$0 sm:$0xff] }
  0xa2   : > { %v607_v49 = vmax.f32 %v578_v44, 0.0  ;;  %v554_v50 = vadd.f32 %v2368_v34, %v553_v48  ;;  %3593 = vst [vmem:[#allocation9_spill] sm:$0xff] %v2455_v18 }
  0xa3   : > { %442 = vst [vmem:[%s2375_s24 + $0x90] sm:$0xff] %v426_v46  ;;  %v418_v51 = vmax.f32 %v373_v47, 0.0  ;;  %v2458_v19 = vmul.f32 %v2395_v58, %v426_v46  ;;  %v2466_v21 = vmul.f32 %v2400_v59, %v426_v46  ;;  %v2469_v22 = vmul.f32 %v2405_v60, %v426_v46 }
  0xa4   : > { %459 = vst [vmem:[#allocation2 + $0x81] sm:$0xff] %v426_v46  ;;  %v599_v52 = vmax.f32 %v554_v50, 0.0  ;;  %v2484_v26 = vmul.f32 %v2418_v3, %v607_v49  ;;  %v2487_v27 = vmul.f32 %v2424_v6, %v607_v49  ;;  %v2490_v28 = vmul.f32 %v2430_v8, %v607_v49 }
  0xa5   : > { %1914 = vst [vmem:[%s2375_s24 + $0x190] sm:$0xff] %v607_v49  ;;  %v743_v1 = vld [vmem:[#allocation2 + $0x18] sm:$0xff]  ;;  %v812_v29 = vmul.f32 %v2395_v58, %v418_v51 }
  0xa6   : > { %641 = vst [vmem:[#allocation2 + $0x141] sm:$0xff] %v607_v49  ;;  %v399_v53 = vpop.f32.mrf.mxu2  ;;  %v761_v10 = vmul.f32 %v2390_v57, %v743_v1  ;;  %v2495_v33 = vmul.f32 %v2405_v60, %v599_v52  ;;  %v1317_v35 = vmul.f32 %v2418_v3, %v599_v52  ;;  %v2499_v36 = vmul.f32 %v2424_v6, %v599_v52 }
  0xa7   : > { %434 = vst [vmem:[%s2375_s24 + $0x10] sm:$0xff] %v418_v51  ;;  %v400_v54 = vadd.f32 %v2368_v34, %v399_v53  ;;  %v580_v55 = vpop.f32.mrf.mxu3  ;;  %v1057_v5 = vld [vmem:[#allocation2 + $0xd8] sm:$0xff] }
  0xa8   : > { %451 = vst [vmem:[#allocation2 + $0x21] sm:$0xff] %v418_v51  ;;  %v375_v56 = vpop.f32.mrf.mxu0  ;;  %v581_v62 = vadd.f32 %v2368_v34, %v580_v55  ;;  %v1266_v14 = vmul.f32 %v2413_v2, %v1057_v5  ;;  %v827_v31 = vadd.f32 %v811_v11, %v761_v10  ;;  %v2504_v37 = vmul.f32 %v2440_v12, %v1057_v5 }
  0xa9   : > { %1906 = vst [vmem:[%s2375_s24 + $0x110] sm:$0xff] %v599_v52  ;;  %v427_v61 = vmax.f32 %v400_v54, 0.0  ;;  %v376_v63 = vadd.f32 %v2368_v34, %v375_v56  ;;  %v556_v0 = vpop.f32.mrf.mxu1  ;;  %v2507_v39 = vmul.f32 %v2450_v16, %v1057_v5  ;;  %v2543_v54 = vld [vmem:[%s3576_s3 + $0x6] ss:$0 sm:$0xff] }
  0xaa   : > { %633 = vst [vmem:[#allocation2 + $0xe1] sm:$0xff] %v599_v52  ;;  %v557_v4 = vadd.f32 %v2368_v34, %v556_v0  ;;  %v608_v7 = vmax.f32 %v581_v62, 0.0  ;;  %v1332_v38 = vadd.f32 %v1316_v15, %v1266_v14 }
  0xab   : > { %443 = vst [vmem:[%s2375_s24 + $0xa0] sm:$0xff] %v427_v61  ;;  %v2432_v9 = vmax.f32 %v376_v63, 0.0  ;;  %v852_v32 = vld [vmem:[#allocation2 + $0x82] sm:$0xff]  ;;  %v2522_v47 = vmul.f32 %v2395_v58, %v427_v61  ;;  %v2525_v48 = vmul.f32 %v2400_v59, %v427_v61  ;;  %v2528_v49 = vmul.f32 %v2405_v60, %v427_v61 }
  0xac   : > { %460 = vst [vmem:[#allocation2 + $0x91] sm:$0xff] %v427_v61  ;;  %v2452_v17 = vmax.f32 %v557_v4, 0.0  ;;  %v2532_v51 = vmul.f32 %v2463_v20, %v852_v32  ;;  %v2535_v52 = vmul.f32 %v2476_v24, %v852_v32  ;;  %v2538_v53 = vmul.f32 %v2481_v25, %v852_v32 }
  0xad   : > { %1915 = vst [vmem:[%s2375_s24 + $0x1a0] sm:$0xff] %v608_v7  ;;  %v1357_v40 = vld [vmem:[#allocation2 + $0x142] sm:$0xff]  ;;  %v2546_v56 = vmul.f32 %v2418_v3, %v608_v7  ;;  %v2553_v1 = vmul.f32 %v2424_v6, %v608_v7  ;;  %v2556_v4 = vmul.f32 %v2430_v8, %v608_v7  ;;  %v2568_v32 = vmul.f32 %v2395_v58, %v2432_v9 }
  0xae   : > { %642 = vst [vmem:[#allocation2 + $0x151] sm:$0xff] %v608_v7  ;;  %v402_v30 = vpop.f32.mrf.mxu2  ;;  %v2549_v62 = vmul.f32 %v2519_v45, %v1357_v40  ;;  %v2559_v10 = vmul.f32 %v2543_v54, %v1357_v40  ;;  %v2562_v11 = vmul.f32 %v2512_v41, %v1357_v40  ;;  %v2574_v40 = vmul.f32 %v2400_v59, %v2432_v9 }
  0xaf   : > { %3594 = vst [vmem:[#allocation10_spill] sm:$0xff] %v2458_v19  ;;  %v744_v23 = vld [vmem:[#allocation2 + $0x20] sm:$0xff]  ;;  %v583_v44 = vpop.f32.mrf.mxu3  ;;  %v403_v50 = vadd.f32 %v2368_v34, %v402_v30 }
  0xb0   : > { %3595 = vst [vmem:[#allocation11_spill] sm:$0xff] %v2466_v21  ;;  %v762_v42 = vmul.f32 %v2390_v57, %v744_v23  ;;  %v843_v43 = vld [vmem:[#allocation2 + $0x1a] sm:$0xff]  ;;  %v844_v46 = vld [vmem:[#allocation2 + $0x22] sm:$0xff]  ;;  %v378_v61 = vpop.f32.mrf.mxu0 }
  0xb1   : > { %3596 = vst [vmem:[#allocation12_spill] sm:$0xff] %v2469_v22  ;;  %v1058_v55 = vld [vmem:[#allocation2 + $0xe0] sm:$0xff]  ;;  %v861_v63 = vmul.f32 %v2463_v20, %v843_v43  ;;  %v559_v5 = vpop.f32.mrf.mxu1  ;;  %v862_v15 = vmul.f32 %v2463_v20, %v844_v46  ;;  %v428_v7 = vmax.f32 %v403_v50, 0.0  ;;  %v584_v43 = vadd.f32 %v2368_v34, %v583_v44 }
  0xb2   : > { %435 = vst [vmem:[%s2375_s24 + $0x20] sm:$0xff] %v2432_v9  ;;  %v1158_v0 = vld [vmem:[#allocation2 + $0xda] sm:$0xff]  ;;  %v828_v14 = vadd.f32 %v812_v29, %v762_v42  ;;  %v1159_v23 = vld [vmem:[#allocation2 + $0xe2] sm:$0xff]  ;;  %v1267_v30 = vmul.f32 %v2413_v2, %v1058_v55  ;;  %v2578_v29 = vmul.f32 %v2418_v3, %v2452_v17  ;;  %v2582_v42 = vmul.f32 %v2424_v6, %v2452_v17 }
  0xb3   : > { %3598 = vst [vmem:[#allocation14_spill] sm:$0xff] %v2484_v26  ;;  %v877_v46 = vadd.f32 %v861_v63, %v827_v31  ;;  %v753_v50 = vld [vmem:[#allocation2 + $0x90] sm:$0xff]  ;;  %v2600_v31 = vmul.f32 %v2481_v25, %v1158_v0  ;;  %v2603_v63 = vmul.f32 %v2481_v25, %v1159_v23  ;;  %v2607_v26 = vmul.f32 %v2450_v16, %v1058_v55 }
  0xb4   : > { %3599 = vst [vmem:[#allocation15_spill] sm:$0xff] %v2487_v27  ;;  %v1367_v27 = vmul.f32 %v2519_v45, %v1159_v23 }
  0xb5   : > { %3600 = vst [vmem:[#allocation16_spill] sm:$0xff] %v2490_v28  ;;  %v2589_v28 = vmul.f32 %v2430_v8, %v2452_v17 }
  0xb6   : > { %452 = vst [vmem:[#allocation2 + $0x31] sm:$0xff] %v2432_v9  ;;  %v609_v9 = vmax.f32 %v584_v43, 0.0  ;;  %v1333_v43 = vadd.f32 %v1317_v35, %v1267_v30 }
  0xb7   : > { %3601 = vst [vmem:[#allocation17_spill] sm:$0xff] %v2495_v33  ;;  %v586_v30 = vpop.f32.mrf.mxu3 }
  0xb8   : > { %3602 = vst [vmem:[#allocation18_spill] sm:$0xff] %v2499_v36  ;;  %v381_v19 = vpop.f32.mrf.mxu0  ;;  %v2642_v36 = vadd.f32 %v1367_v27, %v1333_v43  ;;  %v2655_v27 = vmul.f32 %v2400_v59, %v428_v7 }
  0xb9   : > { %1907 = vst [vmem:[%s2375_s24 + $0x120] sm:$0xff] %v2452_v17 }
  0xba   : > { %3603 = vst [vmem:[#allocation19_spill] sm:$0xff] %v2504_v37 }
  0xbb   : > { %3604 = vst [vmem:[#allocation20_spill] sm:$0xff] %v2507_v39 }
  0xbc   : > { %634 = vst [vmem:[#allocation2 + $0xf1] sm:$0xff] %v2452_v17  ;;  %v1258_v17 = vld [vmem:[#allocation2 + $0x150] sm:$0xff] }
  0xbd   : > { %3605 = vst [vmem:[#allocation21_spill] sm:$0xff] %v2525_v48  ;;  %v745_v44 = vld [vmem:[#allocation2 + $0x30] sm:$0xff]  ;;  %v560_v48 = vadd.f32 %v2368_v34, %v559_v5  ;;  %v587_v5 = vadd.f32 %v2368_v34, %v586_v30  ;;  %v822_v30 = vmul.f32 %v2395_v58, %v428_v7 }
  0xbe   : > { %3606 = vst [vmem:[#allocation22_spill] sm:$0xff] %v2528_v49  ;;  %v405_v49 = vpop.f32.mrf.mxu2 }
  0xbf   : > { %3607 = vst [vmem:[#allocation23_spill] sm:$0xff] %v2532_v51  ;;  %v406_v21 = vadd.f32 %v2368_v34, %v405_v49  ;;  %v562_v49 = vpop.f32.mrf.mxu1 }
  0xc0   : > { %3608 = vst [vmem:[#allocation24_spill] sm:$0xff] %v2535_v52  ;;  %v771_v52 = vmul.f32 %v2390_v57, %v753_v50 }
  0xc1   : > { %3609 = vst [vmem:[#allocation25_spill] sm:$0xff] %v2538_v53  ;;  %v2610_v53 = vmul.f32 %v2543_v54, %v1158_v0 }
  0xc2   : > { %3610 = vst [vmem:[#allocation26_spill] sm:$0xff] %v2549_v62 }
  0xc3   : > { %3611 = vst [vmem:[#allocation27_spill] sm:$0xff] %v2553_v1  ;;  %v2597_v1 = vadd.f32 %v862_v15, %v828_v14  ;;  %v1250_v62 = vld [vmem:[#allocation2 + $0xf0] sm:$0xff]  ;;  %v2613_v14 = vmul.f32 %v2543_v54, %v1159_v23  ;;  %v2618_v15 = vld [vmem:[%s3576_s3 + $0x8] ss:$0 sm:$0xff] }
  0xc4   : > { %3612 = vst [vmem:[#allocation28_spill] sm:$0xff] %v2556_v4  ;;  %v1366_v4 = vmul.f32 %v2519_v45, %v1158_v0  ;;  %v1276_v0 = vmul.f32 %v2413_v2, %v1258_v17  ;;  %v1416_v23 = vmul.f32 %v2450_v16, %v1250_v62 }
  0xc5   : > { %3613 = vst [vmem:[#allocation29_spill] sm:$0xff] %v2559_v10  ;;  %v2595_v10 = vld [vmem:[%s3576_s3 + $0x4] ss:$0 sm:$0xff] }
  0xc6   : > { %3614 = vst [vmem:[#allocation30_spill] sm:$0xff] %v2562_v11  ;;  %v2585_v11 = vmul.f32 %v2440_v12, %v1058_v55  ;;  %v1382_v22 = vadd.f32 %v1366_v4, %v1332_v38  ;;  %v912_v35 = vmul.f32 %v2595_v10, %v745_v44  ;;  %v379_v55 = vadd.f32 %v2368_v34, %v378_v61 }
  0xc7   : > { %3616 = vst [vmem:[#allocation32_spill] sm:$0xff] %v2589_v28  ;;  %v2629_v51 = vmul.f32 %v2595_v10, %v753_v50  ;;  %v2632_v38 = vmul.f32 %v2440_v12, %v753_v50  ;;  %v2635_v4 = vmul.f32 %v2450_v16, %v1258_v17  ;;  %v2638_v28 = vmul.f32 %v2618_v15, %v1258_v17 }
  0xc8   : > { %3615 = vst [vmem:[#allocation31_spill] sm:$0xff] %v2585_v11  ;;  %v420_v61 = vmax.f32 %v379_v55, 0.0  ;;  %v837_v50 = vadd.f32 %v2522_v47, %v771_v52  ;;  %v2649_v55 = vadd.f32 %v2546_v56, %v1276_v0  ;;  %v1268_v17 = vmul.f32 %v2413_v2, %v1250_v62  ;;  %v384_v11 = vpop.f32.mrf.mxu0 }
  0xc9   : > { %444 = vst [vmem:[%s2375_s24 + $0xb0] sm:$0xff] %v428_v7  ;;  %v2658_v47 = vmul.f32 %v2405_v60, %v428_v7  ;;  %v2676_v0 = vmul.f32 %v2424_v6, %v609_v9 }
  0xca   : > { %3617 = vst [vmem:[#allocation33_spill] sm:$0xff] %v2600_v31 }
  0xcb   : > { %3618 = vst [vmem:[#allocation34_spill] sm:$0xff] %v2603_v63 }
  0xcc   : > { %461 = vst [vmem:[#allocation2 + $0x99] sm:$0xff] %v428_v7 }
  0xcd   : > { %3619 = vst [vmem:[#allocation35_spill] sm:$0xff] %v2607_v26 }
  0xce   : > { %3620 = vst [vmem:[#allocation36_spill] sm:$0xff] %v2610_v53  ;;  %v601_v53 = vmax.f32 %v560_v48, 0.0  ;;  %v382_v48 = vadd.f32 %v2368_v34, %v381_v19  ;;  %v1327_v19 = vmul.f32 %v2418_v3, %v609_v9 }
  0xcf   : > { %3621 = vst [vmem:[#allocation37_spill] sm:$0xff] %v2613_v14  ;;  %v763_v14 = vmul.f32 %v2390_v57, %v745_v44 }
  0xd0   : > { %1916 = vst [vmem:[%s2375_s24 + $0x1b0] sm:$0xff] %v609_v9 }
  0xd1   : > { %643 = vst [vmem:[#allocation2 + $0x159] sm:$0xff] %v609_v9  ;;  %v2663_v52 = vadd.f32 %v2568_v32, %v763_v14  ;;  %v2679_v32 = vmul.f32 %v2430_v8, %v609_v9  ;;  %v963_v9 = vmul.f32 %v2400_v59, %v420_v61 }
  0xd2   : > { %3622 = vst [vmem:[#allocation38_spill] sm:$0xff] %v2629_v51  ;;  %v2646_v51 = vmax.f32 %v406_v21, 0.0  ;;  %v563_v21 = vadd.f32 %v2368_v34, %v562_v49 }
  0xd3   : > { %3623 = vst [vmem:[#allocation39_spill] sm:$0xff] %v2632_v38  ;;  %v928_v38 = vadd.f32 %v912_v35, %v877_v46  ;;  %v754_v44 = vld [vmem:[#allocation2 + $0x98] sm:$0xff]  ;;  %v2669_v46 = vmax.f32 %v587_v5, 0.0 }
  0xd4   : > { %3624 = vst [vmem:[#allocation40_spill] sm:$0xff] %v2635_v4  ;;  %v853_v56 = vld [vmem:[#allocation2 + $0x92] sm:$0xff]  ;;  %v772_v7 = vmul.f32 %v2390_v57, %v754_v44 }
  0xd5   : > { %3625 = vst [vmem:[#allocation41_spill] sm:$0xff] %v2638_v28  ;;  %v1432_v28 = vadd.f32 %v1416_v23, %v1382_v22  ;;  %v2666_v22 = vmul.f32 %v2618_v15, %v1250_v62  ;;  %v2672_v43 = vadd.f32 %v2574_v40, %v928_v38  ;;  %v2684_v62 = vadd.f32 %v2578_v29, %v1268_v17  ;;  %v854_v40 = vld [vmem:[#allocation2 + $0x9a] sm:$0xff] }
  0xd6   : > { %436 = vst [vmem:[%s2375_s24 + $0x30] sm:$0xff] %v420_v61  ;;  %v814_v23 = vmul.f32 %v2395_v58, %v420_v61  ;;  %v2691_v38 = vmax.f32 %v382_v48, 0.0  ;;  %v871_v5 = vmul.f32 %v2463_v20, %v853_v56  ;;  %v2698_v29 = vmax.f32 %v563_v21, 0.0 }
  0xd7   : > { %453 = vst [vmem:[#allocation2 + $0x39] sm:$0xff] %v420_v61  ;;  %v2687_v14 = vadd.f32 %v2582_v42, %v1432_v28  ;;  %v2702_v42 = vmul.f32 %v2424_v6, %v601_v53  ;;  %v2705_v17 = vmul.f32 %v2430_v8, %v601_v53  ;;  %v2709_v48 = vmul.f32 %v2395_v58, %v2646_v51 }
  0xd8   : > { %3626 = vst [vmem:[#allocation42_spill] sm:$0xff] %v2655_v27  ;;  %v1259_v35 = vld [vmem:[#allocation2 + $0x158] sm:$0xff]  ;;  %v838_v61 = vadd.f32 %v822_v30, %v772_v7  ;;  %v2714_v21 = vmul.f32 %v2595_v10, %v754_v44  ;;  %v2717_v4 = vmul.f32 %v2476_v24, %v853_v56  ;;  %v1476_v31 = vmul.f32 %v2424_v6, %v2669_v46 }
  0xd9   : > { %3627 = vst [vmem:[#allocation43_spill] sm:$0xff] %v2658_v47  ;;  %v1358_v49 = vld [vmem:[#allocation2 + $0x152] sm:$0xff]  ;;  %v1277_v28 = vmul.f32 %v2413_v2, %v1259_v35  ;;  %v1359_v47 = vld [vmem:[#allocation2 + $0x15a] sm:$0xff]  ;;  %v2743_v18 = vmul.f32 %v2450_v16, %v1259_v35 }
  0xda   : > { %1908 = vst [vmem:[%s2375_s24 + $0x130] sm:$0xff] %v601_v53  ;;  %v1376_v30 = vmul.f32 %v2519_v45, %v1358_v49  ;;  %v2763_v26 = vmul.f32 %v2512_v41, %v1359_v47 }
  0xdb   : > { %3628 = vst [vmem:[#allocation44_spill] sm:$0xff] %v2666_v22  ;;  %v2736_v22 = vmul.f32 %v2481_v25, %v854_v40 }
  0xdc   : > { %635 = vst [vmem:[#allocation2 + $0xf9] sm:$0xff] %v601_v53 }
  0xdd   : > { %3629 = vst [vmem:[#allocation45_spill] sm:$0xff] %v2676_v0  ;;  %v872_v0 = vmul.f32 %v2463_v20, %v854_v40 }
  0xde   : > { %3630 = vst [vmem:[#allocation46_spill] sm:$0xff] %v2679_v32  ;;  %v1319_v32 = vmul.f32 %v2418_v3, %v601_v53  ;;  %v746_v27 = vld [vmem:[#allocation2 + $0x38] sm:$0xff]  ;;  %v2722_v53 = vmul.f32 %v2476_v24, %v854_v40 }
  0xdf   : > { %445 = vst [vmem:[%s2375_s24 + $0xc0] sm:$0xff] %v2646_v51  ;;  %v913_v7 = vmul.f32 %v2595_v10, %v746_v27  ;;  %v764_v63 = vmul.f32 %v2390_v57, %v746_v27  ;;  %v2749_v40 = vadd.f32 %v872_v0, %v838_v61  ;;  %v2752_v27 = vmul.f32 %v2543_v54, %v1359_v47  ;;  %v589_v61 = vpop.f32.mrf.mxu3 }
  0xe0   : > { %462 = vst [vmem:[#allocation2 + $0xa9] sm:$0xff] %v2646_v51 }
  0xe1   : > { %1917 = vst [vmem:[%s2375_s24 + $0x1c0] sm:$0xff] %v2669_v46  ;;  %v830_v33 = vadd.f32 %v814_v23, %v764_v63 }
  0xe2   : > { %3631 = vst [vmem:[#allocation47_spill] sm:$0xff] %v2705_v17  ;;  %v2725_v17 = vmul.f32 %v2440_v12, %v754_v44  ;;  %v1343_v44 = vadd.f32 %v1327_v19, %v1277_v28  ;;  %v929_v19 = vadd.f32 %v913_v7, %v2597_v1 }
  0xe3   : > { %644 = vst [vmem:[#allocation2 + $0x169] sm:$0xff] %v2669_v46  ;;  %v1350_v28 = vld [vmem:[#allocation2 + $0xf2] sm:$0xff]  ;;  %v1351_v7 = vld [vmem:[#allocation2 + $0xfa] sm:$0xff] }
  0xe4   : > { %3632 = vst [vmem:[#allocation48_spill] sm:$0xff] %v2714_v21  ;;  %v2730_v21 = vadd.f32 %v871_v5, %v837_v50  ;;  %v2746_v50 = vmul.f32 %v2543_v54, %v1358_v49  ;;  %v845_v5 = vld [vmem:[#allocation2 + $0x32] sm:$0xff]  ;;  %v979_v63 = vadd.f32 %v963_v9, %v929_v19 }
  0xe5   : > { %3633 = vst [vmem:[#allocation49_spill] sm:$0xff] %v2717_v4  ;;  %v2733_v4 = vmul.f32 %v2481_v25, %v853_v56  ;;  %v846_v56 = vld [vmem:[#allocation2 + $0x3a] sm:$0xff]  ;;  %v1012_v1 = vmul.f32 %v2476_v24, %v845_v5 }
  0xe6   : > { %437 = vst [vmem:[%s2375_s24 + $0x40] sm:$0xff] %v2691_v38  ;;  %v1013_v23 = vmul.f32 %v2476_v24, %v846_v56 }
  0xe7   : > { %3634 = vst [vmem:[#allocation50_spill] sm:$0xff] %v2722_v53  ;;  %v1251_v53 = vld [vmem:[#allocation2 + $0xf8] sm:$0xff]  ;;  %v1028_v19 = vadd.f32 %v1012_v1, %v2672_v43  ;;  %v755_v13 = vld [vmem:[#allocation2 + $0xa8] sm:$0xff] }
  0xe8   : > { %3635 = vst [vmem:[#allocation51_spill] sm:$0xff] %v2725_v17  ;;  %v1377_v17 = vmul.f32 %v2519_v45, %v1359_v47  ;;  %v1269_v0 = vmul.f32 %v2413_v2, %v1251_v53  ;;  %v1417_v47 = vmul.f32 %v2450_v16, %v1251_v53  ;;  %v2799_v25 = vadd.f32 %v1013_v23, %v979_v63 }
  0xe9   : > { %454 = vst [vmem:[#allocation2 + $0x49] sm:$0xff] %v2691_v38 }
  0xea   : > { %3636 = vst [vmem:[#allocation52_spill] sm:$0xff] %v2733_v4  ;;  %v408_v4 = vpop.f32.mrf.mxu2 }
  0xeb   : > { %3637 = vst [vmem:[#allocation53_spill] sm:$0xff] %v2736_v22  ;;  %v2755_v22 = vmul.f32 %v2618_v15, %v1259_v35  ;;  %v864_v35 = vmul.f32 %v2463_v20, %v846_v56 }
  0xec   : > { %1909 = vst [vmem:[%s2375_s24 + $0x140] sm:$0xff] %v2698_v29 }
  0xed   : > { %3638 = vst [vmem:[#allocation54_spill] sm:$0xff] %v2743_v18  ;;  %v1392_v18 = vadd.f32 %v1376_v30, %v2649_v55  ;;  %v2771_v55 = vadd.f32 %v1377_v17, %v1343_v44  ;;  %v2777_v30 = vmul.f32 %v2400_v59, %v2646_v51  ;;  %v1369_v17 = vmul.f32 %v2519_v45, %v1351_v7 }
  0xee   : > { %3639 = vst [vmem:[#allocation55_spill] sm:$0xff] %v2746_v50  ;;  %v2760_v50 = vmul.f32 %v2512_v41, %v1358_v49  ;;  %v1368_v49 = vmul.f32 %v2519_v45, %v1350_v28  ;;  %v2791_v56 = vadd.f32 %v864_v35, %v830_v33  ;;  %v2803_v33 = vmul.f32 %v2618_v15, %v1251_v53 }
  0xef   : > { %636 = vst [vmem:[#allocation2 + $0x109] sm:$0xff] %v2698_v29 }
  0xf0   : > { %3640 = vst [vmem:[#allocation56_spill] sm:$0xff] %v2752_v27  ;;  %v863_v27 = vmul.f32 %v2463_v20, %v845_v5  ;;  %v2783_v5 = vmul.f32 %v2405_v60, %v2646_v51  ;;  %v747_v39 = vld [vmem:[#allocation2 + $0x48] sm:$0xff]  ;;  %v1328_v51 = vmul.f32 %v2418_v3, %v2669_v46 }
  0xf1   : > { %3641 = vst [vmem:[#allocation57_spill] sm:$0xff] %v2755_v22  ;;  %v2769_v22 = vld [vmem:[#allocation2 + $0x168] sm:$0xff]  ;;  %v914_v43 = vmul.f32 %v2595_v10, %v747_v39 }
  0xf2   : > { %3642 = vst [vmem:[#allocation58_spill] sm:$0xff] %v2760_v50  ;;  %v1516_v50 = vmul.f32 %v2543_v54, %v1350_v28  ;;  %v1426_v44 = vmul.f32 %v2450_v16, %v2769_v22  ;;  %v879_v9 = vadd.f32 %v863_v27, %v2663_v52 }
  0xf3   : > { %3643 = vst [vmem:[#allocation59_spill] sm:$0xff] %v2763_v26  ;;  %v1335_v26 = vadd.f32 %v1319_v32, %v1269_v0  ;;  %v1384_v32 = vadd.f32 %v1368_v49, %v2684_v62  ;;  %v1433_v0 = vadd.f32 %v1417_v47, %v2642_v36  ;;  %v2809_v62 = vmul.f32 %v2512_v41, %v1350_v28  ;;  %v411_v49 = vpop.f32.mrf.mxu2 }
  0xf4   : > { %3644 = vst [vmem:[#allocation60_spill] sm:$0xff] %v2771_v55  ;;  %v1442_v37 = vadd.f32 %v1426_v44, %v1392_v18  ;;  %v1532_v52 = vadd.f32 %v1516_v50, %v2687_v14  ;;  %v2812_v36 = vmul.f32 %v2512_v41, %v1351_v7  ;;  %v922_v18 = vmul.f32 %v2595_v10, %v755_v13  ;;  %v565_v50 = vpop.f32.mrf.mxu1 }
  0xf5   : > { %3645 = vst [vmem:[#allocation61_spill] sm:$0xff] %v2783_v5  ;;  %v1517_v5 = vmul.f32 %v2543_v54, %v1351_v7  ;;  %v2806_v27 = vadd.f32 %v1369_v17, %v1335_v26  ;;  %v930_v1 = vadd.f32 %v914_v43, %v879_v9  ;;  %v964_v14 = vmul.f32 %v2400_v59, %v2691_v38 }
  0xf6   : > { %v1252_v55 = vld [vmem:[#allocation2 + $0x108] sm:$0xff]  ;;  %3646 = vst [vmem:[#allocation62_spill] sm:$0xff] %v2803_v33  ;;  %v2814_v35 = vadd.f32 %v1476_v31, %v1442_v37  ;;  %v1483_v26 = vadd.f32 %v2702_v42, %v1433_v0  ;;  %v773_v28 = vmul.f32 %v2390_v57, %v755_v13  ;;  %v1064_v47 = vmul.f32 %v2440_v12, %v747_v39  ;;  %v592_v31 = vpop.f32.mrf.mxu3 }
  0xf7   : > { %3647 = vst [vmem:[#allocation63_spill] sm:$0xff] %v2809_v62  ;;  %v1418_v53 = vmul.f32 %v2450_v16, %v1252_v55  ;;  %v1468_v37 = vmul.f32 %v2424_v6, %v2698_v29  ;;  %v2825_v7 = vadd.f32 %v964_v14, %v930_v1  ;;  %v1567_v23 = vmul.f32 %v2618_v15, %v1252_v55 }
  0xf8   : > { %3648 = vst [vmem:[#allocation64_spill] sm:$0xff] %v2812_v36  ;;  %v409_v17 = vadd.f32 %v2368_v34, %v408_v4  ;;  %v2830_v44 = vmul.f32 %v2440_v12, %v755_v13  ;;  %v1278_v42 = vmul.f32 %v2413_v2, %v2769_v22  ;;  %v590_v9 = vadd.f32 %v2368_v34, %v589_v61  ;;  %v387_v36 = vpop.f32.mrf.mxu0 }
  0xf9   : > { %v1434_v63 = vadd.f32 %v1418_v53, %v1384_v32  ;;  %v385_v0 = vadd.f32 %v2368_v34, %v384_v11  ;;  %v938_v43 = vadd.f32 %v922_v18, %v2730_v21  ;;  %v765_v1 = vmul.f32 %v2390_v57, %v747_v39 }
  0xfa   : > { %3649 = vst [vmem:[#allocation65_spill] sm:$0xff] %v2830_v44  ;;  %v430_v14 = vmax.f32 %v409_v17, 0.0  ;;  %v815_v4 = vmul.f32 %v2395_v58, %v2691_v38  ;;  %v1270_v13 = vmul.f32 %v2413_v2, %v1252_v55  ;;  %v611_v53 = vmax.f32 %v590_v9, 0.0 }
  0xfb   : > { %v2838_v32 = vadd.f32 %v1468_v37, %v1434_v63  ;;  %v566_v44 = vadd.f32 %v2368_v34, %v565_v50  ;;  %v1080_v61 = vadd.f32 %v1064_v47, %v1028_v19  ;;  %v1320_v11 = vmul.f32 %v2418_v3, %v2698_v29  ;;  %v414_v63 = vpop.f32.mrf.mxu2 }
  0xfc   : > { %v1583_v21 = vadd.f32 %v1567_v23, %v1532_v52  ;;  %446 = vst [vmem:[%s2375_s24 + $0xd0] sm:$0xff] %v430_v14  ;;  %v412_v39 = vadd.f32 %v2368_v34, %v411_v49  ;;  %v2849_v18 = vadd.f32 %v2709_v48, %v773_v28  ;;  %v2853_v37 = vmul.f32 %v2618_v15, %v2769_v22 }
  0xfd   : > { %v2857_v55 = vmul.f32 %v2430_v8, %v2669_v46  ;;  %463 = vst [vmem:[#allocation2 + $0xb1] sm:$0xff] %v430_v14  ;;  %v422_v19 = vmax.f32 %v385_v0, 0.0  ;;  %v2859_v50 = vadd.f32 %v1517_v5, %v1483_v26  ;;  %v2861_v52 = vadd.f32 %v1328_v51, %v1278_v42 }
  0xfe   : > { %3650 = vst [vmem:[#allocation66_spill] sm:$0xff] %v2853_v37  ;;  %v1114_v49 = vmul.f32 %v2405_v60, %v2691_v38  ;;  %v1617_v48 = vmul.f32 %v2430_v8, %v2698_v29  ;;  %v2869_v22 = vadd.f32 %v2777_v30, %v938_v43  ;;  %v2871_v28 = vadd.f32 %v815_v4, %v765_v1  ;;  %v568_v29 = vpop.f32.mrf.mxu1 }
  0xff   : > { %3651 = vst [vmem:[#allocation67_spill] sm:$0xff] %v2857_v55  ;;  %v603_v46 = vmax.f32 %v566_v44, 0.0  ;;  %v593_v47 = vadd.f32 %v2368_v34, %v592_v31  ;;  %v2876_v51 = vadd.f32 %v1320_v11, %v1270_v13  ;;  %v431_v38 = vmax.f32 %v412_v39, 0.0  ;;  %v595_v44 = vpop.f32.mrf.mxu3 }
 0x100   : > { %1918 = vst [vmem:[%s2375_s24 + $0x1d0] sm:$0xff] %v611_v53  ;;  %v2874_v5 = vadd.f32 %v1114_v49, %v1080_v61  ;;  %v2878_v26 = vadd.f32 %v1617_v48, %v1583_v21  ;;  %v824_v30 = vmul.f32 %v2395_v58, %v430_v14  ;;  %v973_v23 = vmul.f32 %v2400_v59, %v430_v14 }
 0x101   : > { %645 = vst [vmem:[#allocation2 + $0x171] sm:$0xff] %v611_v53  ;;  %v2884_v17 = vmul.f32 %v2405_v60, %v430_v14  ;;  %v388_v31 = vadd.f32 %v2368_v34, %v387_v36  ;;  %v2888_v42 = vmul.f32 %v2418_v3, %v611_v53  ;;  %v2891_v9 = vmul.f32 %v2424_v6, %v611_v53 }
 0x102   : > { %438 = vst [vmem:[%s2375_s24 + $0x50] sm:$0xff] %v422_v19  ;;  %v2894_v0 = vmul.f32 %v2430_v8, %v611_v53  ;;  %v2897_v43 = vmul.f32 %v2395_v58, %v422_v19  ;;  %v2901_v1 = vmul.f32 %v2400_v59, %v422_v19  ;;  %v612_v36 = vmax.f32 %v593_v47, 0.0 }
 0x103   : > { %3652 = vst [vmem:[#allocation68_spill] sm:$0xff] %v2884_v17  ;;  %v569_v14 = vadd.f32 %v2368_v34, %v568_v29  ;;  %v415_v4 = vadd.f32 %v2368_v34, %v414_v63  ;;  %v2906_v61 = vmul.f32 %v2405_v60, %v422_v19  ;;  %v2909_v53 = vmul.f32 %v2418_v3, %v603_v46  ;;  %v390_v29 = vpop.f32.mrf.mxu0 }
 0x104   : > { %455 = vst [vmem:[#allocation2 + $0x51] sm:$0xff] %v422_v19  ;;  %v756_v13 = vld [vmem:[#allocation2 + $0xb0] sm:$0xff]  ;;  %v2912_v11 = vmul.f32 %v2424_v6, %v603_v46  ;;  %v596_v21 = vadd.f32 %v2368_v34, %v595_v44  ;;  %v2919_v47 = vmul.f32 %v2430_v8, %v603_v46  ;;  %v423_v19 = vmax.f32 %v388_v31, 0.0 }
 0x105   : > { %3653 = vst [vmem:[#allocation69_spill] sm:$0xff] %v2894_v0  ;;  %v774_v39 = vmul.f32 %v2390_v57, %v756_v13  ;;  %v855_v49 = vld [vmem:[#allocation2 + $0xaa] sm:$0xff]  ;;  %v923_v48 = vmul.f32 %v2595_v10, %v756_v13  ;;  %v2922_v0 = vmul.f32 %v2400_v59, %v431_v38  ;;  %v2925_v55 = vmul.f32 %v2405_v60, %v431_v38 }
 0x106   : > { %1910 = vst [vmem:[%s2375_s24 + $0x150] sm:$0xff] %v603_v46  ;;  %v2928_v44 = vmul.f32 %v2418_v3, %v431_v38  ;;  %v2932_v37 = vmul.f32 %v2424_v6, %v612_v36  ;;  %v2936_v31 = vmul.f32 %v2430_v8, %v612_v36  ;;  %v2938_v62 = vmax.f32 %v569_v14, 0.0 }
 0x107   : > { %637 = vst [vmem:[#allocation2 + $0x111] sm:$0xff] %v603_v46  ;;  %v939_v46 = vadd.f32 %v923_v48, %v2749_v40  ;;  %v2940_v33 = vmax.f32 %v415_v4, 0.0  ;;  %v2945_v6 = vmax.f32 %v596_v21, 0.0  ;;  %v2948_v40 = vadd.f32 %v2368_v34, %v390_v29 }
 0x108   : > { %447 = vst [vmem:[%s2375_s24 + $0xe0] sm:$0xff] %v431_v38  ;;  %v1261_v63 = vld [vmem:[#allocation2 + $0x170] sm:$0xff]  ;;  %v840_v48 = vadd.f32 %v824_v30, %v774_v39  ;;  %v2955_v14 = vmul.f32 %v2400_v59, %v423_v19  ;;  %v2966_v34 = vmul.f32 %v2418_v3, %v2938_v62  ;;  %v2971_v29 = vmul.f32 %v2440_v12, %v756_v13 }
 0x109   : > { %464 = vst [vmem:[#allocation2 + $0xc1] sm:$0xff] %v431_v38  ;;  %v1360_v17 = vld [vmem:[#allocation2 + $0x16a] sm:$0xff]  ;;  %v873_v38 = vmul.f32 %v2463_v20, %v855_v49  ;;  %v1427_v8 = vmul.f32 %v2450_v16, %v1261_v63  ;;  %v1279_v4 = vmul.f32 %v2413_v2, %v1261_v63  ;;  %v989_v30 = vadd.f32 %v973_v23, %v939_v46 }
 0x10a   : > { %3654 = vst [vmem:[#allocation70_spill] sm:$0xff] %v2922_v0  ;;  %v1022_v0 = vmul.f32 %v2476_v24, %v855_v49  ;;  %v1378_v21 = vmul.f32 %v2519_v45, %v1360_v17 }
 0x10b   : > { %3655 = vst [vmem:[#allocation71_spill] sm:$0xff] %v2925_v55  ;;  %v856_v55 = vld [vmem:[#allocation2 + $0xb2] sm:$0xff]  ;;  %v847_v46 = vld [vmem:[#allocation2 + $0x4a] sm:$0xff] }
 0x10c   : > { %3656 = vst [vmem:[#allocation72_spill] sm:$0xff] %v2928_v44  ;;  %v2960_v44 = vmul.f32 %v2405_v60, %v423_v19  ;;  %v1023_v39 = vmul.f32 %v2476_v24, %v856_v55 }
 0x10d   : > { %1919 = vst [vmem:[%s2375_s24 + $0x1e0] sm:$0xff] %v612_v36 }
 0x10e   : > { %646 = vst [vmem:[#allocation2 + $0x181] sm:$0xff] %v612_v36  ;;  %v2952_v36 = vmul.f32 %v2395_v58, %v423_v19  ;;  %v874_v58 = vmul.f32 %v2463_v20, %v856_v55 }
 0x10f   : > { %3657 = vst [vmem:[#allocation73_spill] sm:$0xff] %v2936_v31  ;;  %v1361_v31 = vld [vmem:[#allocation2 + $0x172] sm:$0xff] }
 0x110   : > { %439 = vst [vmem:[%s2375_s24 + $0x60] sm:$0xff] %v423_v19  ;;  %v2988_v13 = vadd.f32 %v874_v58, %v840_v48  ;;  %v1527_v48 = vmul.f32 %v2543_v54, %v1361_v31 }
 0x111   : > { %3658 = vst [vmem:[#allocation74_spill] sm:$0xff] %v2945_v6 }
 0x112   : > { %3659 = vst [vmem:[#allocation75_spill] sm:$0xff] %v2948_v40  ;;  %v3668_v40 = vld [vmem:[#allocation60_spill] sm:$0xff] }
 0x113   : > { %456 = vst [vmem:[#allocation2 + $0x61] sm:$0xff] %v423_v19  ;;  %v2975_v19 = vadd.f32 %v873_v38, %v2849_v18  ;;  %v1443_v3 = vadd.f32 %v1427_v8, %v3668_v40  ;;  %v1526_v18 = vmul.f32 %v2543_v54, %v1360_v17  ;;  %v3000_v38 = vadd.f32 %v1023_v39, %v989_v30  ;;  %v848_v8 = vld [vmem:[#allocation2 + $0x52] sm:$0xff] }
 0x114   : > { %3660 = vst [vmem:[#allocation76_spill] sm:$0xff] %v2952_v36  ;;  %v3665_v36 = vld [vmem:[#allocation13_spill] sm:$0xff]  ;;  %v3004_v40 = vmul.f32 %v2618_v15, %v1261_v63 }
 0x115   : > { %3661 = vst [vmem:[#allocation77_spill] sm:$0xff] %v2955_v14  ;;  %v748_v14 = vld [vmem:[#allocation2 + $0x50] sm:$0xff]  ;;  %v2984_v23 = vmul.f32 %v3665_v36, %v856_v55  ;;  %v1164_v58 = vmul.f32 %v3665_v36, %v847_v46  ;;  %v1165_v63 = vmul.f32 %v3665_v36, %v848_v8  ;;  %v1493_v39 = vadd.f32 %v2891_v9, %v1443_v3 }
 0x116   : > { %3662 = vst [vmem:[#allocation78_spill] sm:$0xff] %v2960_v44  ;;  %v2978_v44 = vadd.f32 %v1022_v0, %v2869_v22  ;;  %v1345_v22 = vadd.f32 %v2888_v42, %v1279_v4  ;;  %v1394_v0 = vadd.f32 %v1378_v21, %v2861_v52  ;;  %v915_v55 = vmul.f32 %v2595_v10, %v748_v14  ;;  %v3010_v52 = vld [vmem:[%s3577_s4] ss:$0 sm:$0xff]  ;;  %v1253_v42 = vld [vmem:[#allocation2 + $0x110] sm:$0xff] }
 0x117   : > { %1911 = vst [vmem:[%s2375_s24 + $0x160] sm:$0xff] %v2938_v62  ;;  %v766_v4 = vmul.f32 %v2390_v57, %v748_v14  ;;  %v865_v21 = vmul.f32 %v2463_v20, %v847_v46  ;;  %v866_v3 = vmul.f32 %v2463_v20, %v848_v8 }
 0x118   : > { %3663 = vst [vmem:[#allocation79_spill] sm:$0xff] %v2966_v34  ;;  %v2981_v34 = vmul.f32 %v3665_v36, %v855_v49  ;;  %v1065_v49 = vmul.f32 %v2440_v12, %v748_v14  ;;  %v931_v57 = vadd.f32 %v915_v55, %v2791_v56  ;;  %v1015_v56 = vmul.f32 %v2476_v24, %v848_v8 }
 0x119   : > { %3664 = vst [vmem:[#allocation80_spill] sm:$0xff] %v2971_v29  ;;  %v1379_v29 = vmul.f32 %v2519_v45, %v1361_v31  ;;  %v3038_v9 = vadd.f32 %v865_v21, %v2871_v28  ;;  %v1353_v28 = vld [vmem:[#allocation2 + $0x112] sm:$0xff] }
 0x11a   : > { %638 = vst [vmem:[#allocation2 + $0x121] sm:$0xff] %v2938_v62  ;;  %v1081_v30 = vadd.f32 %v1065_v49, %v2799_v25  ;;  %v1419_v25 = vmul.f32 %v2450_v16, %v1253_v42  ;;  %v3031_v49 = vmul.f32 %v2512_v41, %v1361_v31 }
 0x11b   : > { %3666 = vst [vmem:[#allocation13_spill] sm:$0xff] %v2981_v34  ;;  %v3022_v34 = vmul.f32 %v2512_v41, %v1360_v17 }
 0x11c   : > { %3667 = vst [vmem:[#allocation81_spill] sm:$0xff] %v2984_v23  ;;  %v1180_v23 = vadd.f32 %v1164_v58, %v2874_v5  ;;  %v1131_v14 = vadd.f32 %v2906_v61, %v1081_v30  ;;  %v832_v5 = vadd.f32 %v2897_v43, %v766_v4  ;;  %v1271_v43 = vmul.f32 %v2413_v2, %v1253_v42 }
 0x11d   : > { %448 = vst [vmem:[%s2375_s24 + $0xf0] sm:$0xff] %v2940_v33  ;;  %v1435_v8 = vadd.f32 %v1419_v25, %v2806_v27  ;;  %v1668_v58 = vmul.f32 %v2512_v41, %v1353_v28 }
 0x11e   : > { %465 = vst [vmem:[#allocation2 + $0xc9] sm:$0xff] %v2940_v33  ;;  %v1199_v17 = vadd.f32 %v3010_v52, %v1180_v23  ;;  %v1181_v61 = vadd.f32 %v1165_v63, %v1131_v14  ;;  %v981_v23 = vadd.f32 %v2901_v1, %v931_v57  ;;  %v1337_v14 = vadd.f32 %v2909_v53, %v1271_v43 }
 0x11f   : > { %1920 = vst [vmem:[%s2375_s24 + $0x1f0] sm:$0xff] %v2945_v6 }
 0x120   : > { %3669 = vst [vmem:[#allocation60_spill] sm:$0xff] %v3000_v38  ;;  %v3025_v38 = vadd.f32 %v1379_v29, %v1345_v22  ;;  %v1410_v29 = vld [vmem:[#allocation2 + $0x180] sm:$0xff]  ;;  %v1215_v31 = vmax.f32 %v1199_v17, 0.0  ;;  %v1568_v22 = vmul.f32 %v2618_v15, %v1253_v42  ;;  %v1200_v55 = vadd.f32 %v3010_v52, %v1181_v61 }
 0x121   : > { %3670 = vst [vmem:[#allocation82_spill] sm:$0xff] %v3004_v40  ;;  %v3019_v40 = vadd.f32 %v1526_v18, %v2814_v35  ;;  %v1014_v35 = vmul.f32 %v2476_v24, %v847_v46  ;;  %v3041_v18 = vadd.f32 %v1527_v48, %v1493_v39  ;;  %v905_v46 = vld [vmem:[#allocation2 + $0xc0] sm:$0xff]  ;;  %v1428_v21 = vmul.f32 %v2450_v16, %v1410_v29 }
 0x122   : > { %647 = vst [vmem:[#allocation2 + $0x189] sm:$0xff] %v2945_v6  ;;  %v1352_v6 = vld [vmem:[#allocation2 + $0x10a] sm:$0xff]  ;;  %v1584_v48 = vadd.f32 %v1568_v22, %v2859_v50  ;;  %v1216_v30 = vmax.f32 %v1200_v55, 0.0  ;;  %v924_v63 = vmul.f32 %v2595_v10, %v905_v46  ;;  %v1074_v42 = vmul.f32 %v2440_v12, %v905_v46  ;;  %v3065_v61 = vld [vmem:[#allocation2 + $0x120] sm:$0xff] }
 0x123   : > { %v1667_v20 = vmul.f32 %v2512_v41, %v1352_v6  ;;  %1231 = vst [vmem:[%s2375_s24 + $0x28] sm:$0xff] %v1215_v31  ;;  %v1370_v1 = vmul.f32 %v2519_v45, %v1352_v6  ;;  %v1371_v39 = vmul.f32 %v2519_v45, %v1353_v28  ;;  %v1444_v50 = vadd.f32 %v1428_v21, %v1394_v0 }
 0x124   : > { %v1634_v27 = vadd.f32 %v2919_v47, %v1584_v48  ;;  %1232 = vst [vmem:[%s2375_s24 + $0x38] sm:$0xff] %v1216_v30  ;;  %v1518_v25 = vmul.f32 %v2543_v54, %v1352_v6  ;;  %v1519_v17 = vmul.f32 %v2543_v54, %v1353_v28  ;;  %v3072_v0 = vadd.f32 %v1014_v35, %v2825_v7 }
 0x125   : > { %v1683_v4 = vadd.f32 %v1667_v20, %v2878_v26  ;;  %v1485_v26 = vadd.f32 %v2912_v11, %v1435_v8  ;;  %v1264_v20 = vmul.f32 %v2413_v2, %v905_v46  ;;  %v3069_v47 = vadd.f32 %v2932_v37, %v1444_v50  ;;  %v906_v46 = vld [vmem:[#allocation2 + $0xc8] sm:$0xff]  ;;  %v3672_v8 = vld [vmem:[#allocation7_spill] sm:$0xff] }
 0x126   : > { %v1684_v31 = vadd.f32 %v1668_v58, %v1634_v27  ;;  %v940_v53 = vadd.f32 %v924_v63, %v2975_v19  ;;  %v1090_v11 = vadd.f32 %v1074_v42, %v2978_v44  ;;  %v1577_v6 = vmul.f32 %v2618_v15, %v1410_v29  ;;  %v1007_v58 = vld [vmem:[#allocation2 + $0xca] sm:$0xff] }
 0x127   : > { %v1699_v57 = vadd.f32 %v3010_v52, %v1683_v4  ;;  %v3077_v55 = vadd.f32 %v866_v3, %v832_v5  ;;  %v1386_v54 = vadd.f32 %v1370_v1, %v2876_v51  ;;  %v1420_v37 = vmul.f32 %v2450_v16, %v3065_v61  ;;  %v1006_v3 = vld [vmem:[#allocation2 + $0xc2] sm:$0xff]  ;;  %v3673_v4 = vld [vmem:[#allocation70_spill] sm:$0xff] }
 0x128   : > { %v1700_v43 = vadd.f32 %v3010_v52, %v1684_v31  ;;  %v3084_v7 = vadd.f32 %v1015_v56, %v981_v23  ;;  %v3086_v35 = vadd.f32 %v1371_v39, %v1337_v14  ;;  %v3089_v44 = vadd.f32 %v1518_v25, %v2838_v32  ;;  %v3671_v51 = vld [vmem:[#allocation72_spill] sm:$0xff]  ;;  %v3674_v56 = vld [vmem:[#allocation71_spill] sm:$0xff] }
 0x129   : > { %v1715_v22 = vmax.f32 %v1699_v57, 0.0  ;;  %v3091_v19 = vadd.f32 %v1519_v17, %v1485_v26  ;;  %v1330_v29 = vadd.f32 %v3671_v51, %v1264_v20  ;;  %v1436_v28 = vadd.f32 %v1420_v37, %v1386_v54  ;;  %v1411_v14 = vld [vmem:[#allocation2 + $0x188] sm:$0xff]  ;;  %v3675_v25 = vld [vmem:[#allocation60_spill] sm:$0xff] }
 0x12a   : > { %v1716_v5 = vmax.f32 %v1700_v43, 0.0  ;;  %v1470_v48 = vmul.f32 %v3672_v8, %v2938_v62  ;;  %v990_v21 = vadd.f32 %v3673_v4, %v940_v53  ;;  %v1140_v23 = vadd.f32 %v3674_v56, %v1090_v11  ;;  %v3676_v53 = vld [vmem:[#allocation6_spill] sm:$0xff]  ;;  %v3677_v11 = vld [vmem:[#allocation19_spill] sm:$0xff]  ;;  %v749_v37 = vld [vmem:[#allocation2 + $0x60] sm:$0xff] }
 0x12b   : > { %1943 = vst [vmem:[%s2375_s24 + $0x128] sm:$0xff] %v1715_v22  ;;  %v1593_v30 = vadd.f32 %v1577_v6, %v3019_v40  ;;  %v925_v32 = vmul.f32 %v2595_v10, %v906_v46  ;;  %v975_v63 = vmul.f32 %v2400_v59, %v2940_v33  ;;  %v1024_v42 = vmul.f32 %v2476_v24, %v1006_v3 }
 0x12c   : > { %1944 = vst [vmem:[%s2375_s24 + $0x138] sm:$0xff] %v1716_v5  ;;  %v3101_v1 = vadd.f32 %v1470_v48, %v1436_v28  ;;  %v1075_v39 = vmul.f32 %v2440_v12, %v906_v46  ;;  %v1025_v57 = vmul.f32 %v2476_v24, %v1007_v58  ;;  %v1125_v50 = vmul.f32 %v2405_v60, %v2940_v33 }
 0x12d   : > { %v941_v27 = vadd.f32 %v925_v32, %v2988_v13  ;;  %v1174_v40 = vmul.f32 %v3665_v36, %v1006_v3  ;;  %v1040_v26 = vadd.f32 %v1024_v42, %v990_v21  ;;  %v1175_v31 = vmul.f32 %v3665_v36, %v1007_v58  ;;  %v3680_v21 = vld [vmem:[#allocation31_spill] sm:$0xff] }
 0x12e   : > { %v1091_v17 = vadd.f32 %v1075_v39, %v3675_v25  ;;  %v1265_v59 = vmul.f32 %v2413_v2, %v906_v46  ;;  %v1315_v13 = vmul.f32 %v3676_v53, %v2940_v33  ;;  %v1364_v24 = vmul.f32 %v2519_v45, %v1006_v3  ;;  %v3678_v46 = vld [vmem:[#allocation8_spill] sm:$0xff]  ;;  %v3679_v3 = vld [vmem:[#allocation74_spill] sm:$0xff] }
 0x12f   : > { %v991_v22 = vadd.f32 %v975_v63, %v941_v27  ;;  %v1190_v20 = vadd.f32 %v1174_v40, %v1140_v23  ;;  %v1092_v6 = vadd.f32 %v3677_v11, %v1040_v26  ;;  %v1365_v54 = vmul.f32 %v2519_v45, %v1007_v58  ;;  %v3682_v63 = vld [vmem:[#allocation33_spill] sm:$0xff]  ;;  %v571_v27 = vpop.f32.mrf.mxu1  ;;  %v3687_v11 = vld [vmem:[#allocation34_spill] sm:$0xff] }
 0x130   : > { %v1141_v60 = vadd.f32 %v1125_v50, %v1091_v17  ;;  %v1429_v43 = vmul.f32 %v2450_v16, %v1411_v14  ;;  %v1331_v51 = vadd.f32 %v1315_v13, %v1265_v59  ;;  %v1380_v2 = vadd.f32 %v1364_v24, %v1330_v29  ;;  %v3681_v16 = vld [vmem:[#allocation20_spill] sm:$0xff]  ;;  %v3685_v26 = vld [vmem:[#allocation9_spill] sm:$0xff] }
 0x131   : > { %v1041_v5 = vadd.f32 %v1025_v57, %v991_v22  ;;  %v1209_v36 = vadd.f32 %v3010_v52, %v1190_v20  ;;  %v1142_v28 = vadd.f32 %v3678_v46, %v1092_v6  ;;  %v1479_v4 = vmul.f32 %v3672_v8, %v3679_v3  ;;  %v3683_v57 = vld [vmem:[#allocation17_spill] sm:$0xff]  ;;  %v3684_v8 = vld [vmem:[#allocation35_spill] sm:$0xff] }
 0x132   : > { %v1191_v48 = vadd.f32 %v1175_v31, %v1141_v60  ;;  %v1445_v33 = vadd.f32 %v1429_v43, %v3025_v38  ;;  %v1381_v58 = vadd.f32 %v1365_v54, %v1331_v51  ;;  %v1430_v23 = vadd.f32 %v3681_v16, %v1380_v2  ;;  %v3138_v17 = vld [vmem:[#allocation2 + $0x182] sm:$0xff]  ;;  %v3142_v53 = vld [vmem:[#allocation2 + $0x18a] sm:$0xff] }
 0x133   : > { %v1093_v56 = vadd.f32 %v3680_v21, %v1041_v5  ;;  %v1225_v45 = vmax.f32 %v1209_v36, 0.0  ;;  %v916_v32 = vmul.f32 %v2595_v10, %v749_v37  ;;  %v1192_v42 = vadd.f32 %v3682_v63, %v1142_v28  ;;  %v3686_v31 = vld [vmem:[#allocation73_spill] sm:$0xff]  ;;  %v3688_v60 = vld [vmem:[#allocation18_spill] sm:$0xff]  ;;  %v3689_v43 = vld [vmem:[#allocation36_spill] sm:$0xff] }
 0x134   : > { %v1210_v29 = vadd.f32 %v3010_v52, %v1191_v48  ;;  %v3131_v39 = vadd.f32 %v1479_v4, %v1445_v33  ;;  %v1066_v38 = vmul.f32 %v2440_v12, %v749_v37  ;;  %v1431_v40 = vadd.f32 %v3684_v8, %v1381_v58  ;;  %v681_v12 = vpop.f32.mrf.mxu2  ;;  %v3155_v51 = vld [vmem:[%s3576_s3 + $0x9] ss:$0 sm:$0xff]  ;;  %v3691_v48 = vld [vmem:[#allocation44_spill] sm:$0xff] }
 0x135   : > { %v1143_v50 = vadd.f32 %v3683_v57, %v1093_v56  ;;  %1241 = vst [vmem:[%s2375_s24 + $0xc8] sm:$0xff] %v1225_v45  ;;  %v1480_v25 = vadd.f32 %v3685_v26, %v1430_v23  ;;  %v1643_v59 = vadd.f32 %v3686_v31, %v1593_v30  ;;  %v1211_v22 = vadd.f32 %v3010_v52, %v1192_v42  ;;  %v3690_v46 = vld [vmem:[#allocation37_spill] sm:$0xff]  ;;  %v3692_v56 = vld [vmem:[#allocation75_spill] sm:$0xff]  ;;  %v3693_v23 = vld [vmem:[#allocation62_spill] sm:$0xff]  ;;  %v727_v57 = vpop.f32.mrf.mxu3 }
 0x136   : > { %v1226_v20 = vmax.f32 %v1210_v29, 0.0  ;;  %v1578_v13 = vmul.f32 %v2618_v15, %v1411_v14  ;;  %v1569_v24 = vmul.f32 %v2618_v15, %v3065_v61  ;;  %v1481_v54 = vadd.f32 %v3688_v60, %v1431_v40  ;;  %v3694_v42 = vld [vmem:[#allocation32_spill] sm:$0xff]  ;;  %v393_v60 = vpop.f32.mrf.mxu0 }
 0x137   : > { %v1193_v6 = vadd.f32 %v3687_v11, %v1143_v50  ;;  %v1530_v5 = vadd.f32 %v3689_v43, %v1480_v25  ;;  %v1227_v36 = vmax.f32 %v1211_v22, 0.0  ;;  %v1628_v14 = vmul.f32 %v3155_v51, %v3679_v3  ;;  %v3171_v3 = vld [vmem:[%s3575_s2] ss:$0 sm:$0xff] }
 0x138   : > { %1242 = vst [vmem:[%s2375_s24 + $0xd8] sm:$0xff] %v1226_v20  ;;  %v1594_v30 = vadd.f32 %v1578_v13, %v3041_v18  ;;  %v1677_v15 = vmul.f32 %v2512_v41, %v3138_v17  ;;  %v1531_v28 = vadd.f32 %v3690_v46, %v1481_v54  ;;  %v1678_v18 = vmul.f32 %v2512_v41, %v3142_v53  ;;  %v3180_v50 = vld [vmem:[%s3576_s3] ss:$0 sm:$0xff]  ;;  %v3696_v20 = vld [vmem:[#allocation63_spill] sm:$0xff]  ;;  %v574_v54 = vpop.f32.mrf.mxu1 }
 0x139   : > { %v1212_v2 = vadd.f32 %v3010_v52, %v1193_v6  ;;  %v1581_v33 = vadd.f32 %v3691_v48, %v1530_v5  ;;  %1243 = vst [vmem:[%s2375_s24 + $0xe8] sm:$0xff] %v1227_v36  ;;  %v424_v45 = vmax.f32 %v3692_v56, 0.0  ;;  %v572_v58 = vadd.f32 %v3171_v3, %v571_v27  ;;  %v3186_v40 = vld [vmem:[%s3576_s3] ss:$0 sm:$0xff] }
 0x13a   : > { %v1644_v4 = vadd.f32 %v1628_v14, %v1594_v30  ;;  %v1693_v21 = vadd.f32 %v1677_v15, %v1643_v59  ;;  %v1582_v63 = vadd.f32 %v3693_v23, %v1531_v28  ;;  %v682_v41 = vadd.f32 %v3171_v3, %v681_v12  ;;  %v3695_v59 = vld [vmem:[#allocation47_spill] sm:$0xff]  ;;  %v3698_v28 = vld [vmem:[#allocation76_spill] sm:$0xff] }
 0x13b   : > { %v1228_v16 = vmax.f32 %v1212_v2, 0.0  ;;  %v1631_v29 = vadd.f32 %v3694_v42, %v1581_v33  ;;  %v767_v8 = vmul.f32 %v3180_v50, %v749_v37  ;;  %v1272_v27 = vmul.f32 %v3186_v40, %v3065_v61  ;;  %440 = vst [vmem:[%s2375_s24 + $0x70] sm:$0xff] %v424_v45  ;;  %v3699_v33 = vld [vmem:[#allocation79_spill] sm:$0xff]  ;;  %v3229_v42 = vld [vmem:[%s3576_s3 + $0x1] ss:$0 sm:$0xff] }
 0x13c   : > { %v1694_v26 = vadd.f32 %v1678_v18, %v1644_v4  ;;  %v1709_v25 = vadd.f32 %v3010_v52, %v1693_v21  ;;  %v932_v31 = vadd.f32 %v916_v32, %v3038_v9  ;;  %v1632_v22 = vadd.f32 %v3695_v59, %v1582_v63  ;;  %457 = vst [vmem:[#allocation2 + $0x69] sm:$0xff] %v424_v45  ;;  %v3697_v32 = vld [vmem:[#allocation64_spill] sm:$0xff]  ;;  %v684_v46 = vpop.f32.mrf.mxu2  ;;  %v3700_v21 = vld [vmem:[#allocation77_spill] sm:$0xff] }
 0x13d   : > { %1244 = vst [vmem:[%s2375_s24 + $0xf8] sm:$0xff] %v1228_v16  ;;  %v1681_v37 = vadd.f32 %v3696_v20, %v1631_v29  ;;  %v605_v13 = vmax.f32 %v572_v58, 0.0  ;;  %v687_v6 = vmax.f32 %v682_v41, 0.0  ;;  %v728_v61 = vadd.f32 %v3171_v3, %v727_v57  ;;  %v3701_v58 = vld [vmem:[#allocation78_spill] sm:$0xff]  ;;  %v3235_v41 = vld [vmem:[%s3576_s3 + $0x5] ss:$0 sm:$0xff] }
 0x13e   : > { %v1710_v12 = vadd.f32 %v3010_v52, %v1694_v26  ;;  %v1725_v11 = vmax.f32 %v1709_v25, 0.0  ;;  %v1082_v43 = vadd.f32 %v1066_v38, %v3072_v0  ;;  %v1585_v9 = vadd.f32 %v1569_v24, %v3089_v44  ;;  %v2051_v59 = vld [vmem:[%s3576_s3 + $0x1] ss:$0 sm:$0xff]  ;;  %v3252_v20 = vld [vmem:[%s3576_s3 + $0x5] ss:$0 sm:$0xff] }
 0x13f   : > { %v1682_v5 = vadd.f32 %v3697_v32, %v1632_v22  ;;  %v1697_v36 = vadd.f32 %v3010_v52, %v1681_v37  ;;  %1912 = vst [vmem:[%s2375_s24 + $0x170] sm:$0xff] %v605_v13  ;;  %v1619_v30 = vmul.f32 %v3155_v51, %v2938_v62  ;;  %v3206_v15 = vmul.f32 0.0, %v687_v6  ;;  %v3282_v32 = vld [vmem:[%s3576_s3 + $0xa] ss:$0 sm:$0xff] }
 0x140   : > { %v1726_v14 = vmax.f32 %v1710_v12, 0.0  ;;  %1953 = vst [vmem:[%s2375_s24 + $0x1c8] sm:$0xff] %v1725_v11  ;;  %v733_v2 = vmax.f32 %v728_v61, 0.0  ;;  %v394_v44 = vadd.f32 %v3171_v3, %v393_v60  ;;  %v575_v24 = vadd.f32 %v3171_v3, %v574_v54 }
 0x141   : > { %v1698_v0 = vadd.f32 %v3010_v52, %v1682_v5  ;;  %v1713_v38 = vmax.f32 %v1697_v36, 0.0  ;;  %639 = vst [vmem:[#allocation2 + $0x129] sm:$0xff] %v605_v13  ;;  %v833_v48 = vadd.f32 %v3698_v28, %v767_v8  ;;  %v3213_v18 = vadd.f32 %v3699_v33, %v1272_v27  ;;  %v3241_v8 = vld [vmem:[%s3576_s3 + $0x9] ss:$0 sm:$0xff] }
 0x142   : > { %1954 = vst [vmem:[%s2375_s24 + $0x1d8] sm:$0xff] %v1726_v14  ;;  %v3216_v62 = vmul.f32 0.0, %v733_v2  ;;  %v3219_v4 = vadd.f32 %v3171_v3, %v684_v46  ;;  %v982_v56 = vadd.f32 %v3700_v21, %v932_v31  ;;  %v1132_v16 = vadd.f32 %v3701_v58, %v1082_v43  ;;  %v3270_v43 = vld [vmem:[%s3576_s3 + $0x2] ss:$0 sm:$0xff]  ;;  %v3293_v14 = vld [vmem:[%s3576_s3 + $0x6] ss:$0 sm:$0xff] }
 0x143   : > { %v3223_v23 = vadd.f32 %v1619_v30, %v1585_v9  ;;  %v1714_v63 = vmax.f32 %v1698_v0, 0.0  ;;  %1941 = vst [vmem:[%s2375_s24 + $0x108] sm:$0xff] %v1713_v38  ;;  %v818_v29 = vmul.f32 %v3229_v42, %v424_v45  ;;  %v967_v57 = vmul.f32 %v3235_v41, %v424_v45  ;;  %v750_v25 = vld [vmem:[#allocation2 + $0x68] sm:$0xff] }
 0x144   : > { %3702 = vst [vmem:[#allocation72_spill] sm:$0xff] %v3241_v8  ;;  %v1117_v27 = vmul.f32 %v3241_v8, %v424_v45  ;;  %v425_v26 = vmax.f32 %v394_v44, 0.0  ;;  %v849_v31 = vld [vmem:[#allocation2 + $0x62] sm:$0xff]  ;;  %v1323_v22 = vmul.f32 %v2051_v59, %v605_v13  ;;  %v1471_v37 = vmul.f32 %v3252_v20, %v605_v13  ;;  %v850_v54 = vld [vmem:[#allocation2 + $0x6a] sm:$0xff] }
 0x145   : > { %692 = vst [vmem:[#allocation2 + $0x1] sm:$0xff] %v3206_v15  ;;  %v3256_v45 = vmul.f32 %v3155_v51, %v605_v13  ;;  %v3258_v12 = vmax.f32 %v575_v24, 0.0  ;;  %v768_v11 = vmul.f32 %v3180_v50, %v750_v25  ;;  %v917_v6 = vmul.f32 %v2595_v10, %v750_v25  ;;  %v3276_v9 = vld [vmem:[%s3576_s3 + $0x8] ss:$0 sm:$0xff] }
 0x146   : > { %1942 = vst [vmem:[%s2375_s24 + $0x118] sm:$0xff] %v1714_v63  ;;  %v3264_v61 = vmul.f32 %v3229_v42, %v425_v26  ;;  %v867_v13 = vmul.f32 %v3270_v43, %v849_v31  ;;  %v1067_v10 = vmul.f32 %v3276_v9, %v750_v25  ;;  %v1166_v5 = vmul.f32 %v3282_v32, %v849_v31 }
 0x147   : > { %739 = vst [vmem:[#allocation2 + $0x199] sm:$0xff] %v3216_v62  ;;  %v3287_v36 = vmul.f32 %v3235_v41, %v425_v26  ;;  %v933_v30 = vadd.f32 %v917_v6, %v3077_v55  ;;  %v1016_v2 = vmul.f32 %v3293_v14, %v849_v31  ;;  %v3297_v0 = vmul.f32 %v3241_v8, %v425_v26 }
 0x148   : > { %441 = vst [vmem:[%s2375_s24 + $0x80] sm:$0xff] %v425_v26  ;;  %v1255_v46 = vld [vmem:[#allocation2 + $0x128] sm:$0xff]  ;;  %v3300_v38 = vmul.f32 %v2051_v59, %v3258_v12  ;;  %v1083_v44 = vadd.f32 %v1067_v10, %v3084_v7  ;;  %v1167_v24 = vmul.f32 %v3282_v32, %v850_v54  ;;  %v1182_v55 = vadd.f32 %v1166_v5, %v1132_v16  ;;  %v3314_v16 = vld [vmem:[%s3576_s3 + $0x4] ss:$0 sm:$0xff]  ;;  %v3328_v5 = vld [vmem:[%s3576_s3 + $0x6] ss:$0 sm:$0xff] }
 0x149   : > { %458 = vst [vmem:[#allocation2 + $0x79] sm:$0xff] %v425_v26  ;;  %v1273_v28 = vmul.f32 %v3186_v40, %v1255_v46  ;;  %v1354_v33 = vld [vmem:[#allocation2 + $0x122] sm:$0xff]  ;;  %v1355_v21 = vld [vmem:[#allocation2 + $0x12a] sm:$0xff]  ;;  %v834_v58 = vadd.f32 %v818_v29, %v768_v11  ;;  %v868_v63 = vmul.f32 %v3270_v43, %v850_v54  ;;  %v983_v25 = vadd.f32 %v967_v57, %v933_v30 }
 0x14a   : > { %1913 = vst [vmem:[%s2375_s24 + $0x180] sm:$0xff] %v3258_v12  ;;  %v1017_v26 = vmul.f32 %v3293_v14, %v850_v54  ;;  %v883_v31 = vadd.f32 %v867_v13, %v833_v48  ;;  %v1133_v59 = vadd.f32 %v1117_v27, %v1083_v44  ;;  %v1201_v7 = vadd.f32 %v3010_v52, %v1182_v55  ;;  %v3320_v57 = vld [vmem:[%s3576_s3 + $0x2] ss:$0 sm:$0xff] }
 0x14b   : > { %640 = vst [vmem:[#allocation2 + $0x139] sm:$0xff] %v3258_v12  ;;  %v1421_v6 = vmul.f32 %v3314_v16, %v1255_v46  ;;  %v1032_v10 = vadd.f32 %v1016_v2, %v982_v56  ;;  %v1339_v29 = vadd.f32 %v1323_v22, %v1273_v28  ;;  %v1372_v48 = vmul.f32 %v3320_v57, %v1354_v33  ;;  %v3334_v2 = vld [vmem:[%s3576_s3 + $0x8] ss:$0 sm:$0xff] }
 0x14c   : > { %v1373_v27 = vmul.f32 %v3320_v57, %v1355_v21  ;;  %v1183_v11 = vadd.f32 %v1167_v24, %v1133_v59  ;;  %v1217_v54 = vmax.f32 %v1201_v7, 0.0  ;;  %v1520_v56 = vmul.f32 %v3328_v5, %v1354_v33 }
 0x14d   : > { %v1437_v13 = vadd.f32 %v1421_v6, %v3086_v35  ;;  %v884_v22 = vadd.f32 %v868_v63, %v834_v58  ;;  %v1033_v30 = vadd.f32 %v1017_v26, %v983_v25  ;;  %v1570_v44 = vmul.f32 %v3334_v2, %v1255_v46  ;;  %v3340_v35 = vld [vmem:[%s3576_s3 + $0xa] ss:$0 sm:$0xff] }
 0x14e   : > { %v1669_v24 = vmul.f32 %v3340_v35, %v1354_v33  ;;  %v1202_v55 = vadd.f32 %v3010_v52, %v1183_v11  ;;  %1233 = vst [vmem:[%s2375_s24 + $0x48] sm:$0xff] %v1217_v54  ;;  %v1521_v58 = vmul.f32 %v3328_v5, %v1355_v21  ;;  %v1670_v63 = vmul.f32 %v3340_v35, %v1355_v21 }
 0x14f   : > { %v1487_v28 = vadd.f32 %v1471_v37, %v1437_v13  ;;  %v1586_v46 = vadd.f32 %v1570_v44, %v3091_v19  ;;  %v3352_v11 = vadd.f32 %v1372_v48, %v3213_v18  ;;  %v3354_v37 = vadd.f32 %v1373_v27, %v1339_v29  ;;  %v3703_v13 = vld [vmem:[#allocation10_spill] sm:$0xff]  ;;  %v3370_v29 = vld [vmem:[%s3576_s3 + $0x4] ss:$0 sm:$0xff] }
 0x150   : > { %v751_v25 = vld [vmem:[#allocation2 + $0x78] sm:$0xff]  ;;  %v752_v26 = vld [vmem:[#allocation2 + $0x80] sm:$0xff]  ;;  %v1685_v59 = vadd.f32 %v1669_v24, %v3223_v23  ;;  %v1218_v60 = vmax.f32 %v1202_v55, 0.0  ;;  %v3357_v21 = vadd.f32 %v1520_v56, %v3101_v1 }
 0x151   : > { %v769_v7 = vmul.f32 %v3180_v50, %v751_v25  ;;  %v770_v6 = vmul.f32 %v3180_v50, %v752_v26  ;;  %v851_v33 = vld [vmem:[#allocation2 + $0x7a] sm:$0xff]  ;;  %v1636_v54 = vadd.f32 %v3256_v45, %v1586_v46  ;;  %v3364_v24 = vadd.f32 %v1521_v58, %v1487_v28 }
 0x152   : > { %v1701_v19 = vadd.f32 %v3010_v52, %v1685_v59  ;;  %1234 = vst [vmem:[%s2375_s24 + $0x58] sm:$0xff] %v1218_v60  ;;  %v869_v18 = vmul.f32 %v3270_v43, %v851_v33  ;;  %v918_v1 = vmul.f32 %v3370_v29, %v751_v25  ;;  %v919_v45 = vmul.f32 %v3370_v29, %v752_v26  ;;  %v3377_v59 = vld [vmem:[#allocation2 + $0x138] sm:$0xff] }
 0x153   : > { %v835_v23 = vadd.f32 %v3264_v61, %v769_v7  ;;  %v836_v44 = vadd.f32 %v3703_v13, %v770_v6  ;;  %v1686_v48 = vadd.f32 %v1670_v63, %v1636_v54  ;;  %v3704_v61 = vld [vmem:[#allocation23_spill] sm:$0xff]  ;;  %v1018_v60 = vmul.f32 %v3293_v14, %v851_v33  ;;  %v3705_v6 = vld [vmem:[#allocation48_spill] sm:$0xff]  ;;  %v3706_v54 = vld [vmem:[#allocation38_spill] sm:$0xff] }
 0x154   : > { %v1717_v27 = vmax.f32 %v1701_v19, 0.0  ;;  %v934_v28 = vadd.f32 %v918_v1, %v883_v31  ;;  %v935_v58 = vadd.f32 %v919_v45, %v884_v22  ;;  %v1068_v46 = vmul.f32 %v3276_v9, %v751_v25  ;;  %v3707_v31 = vld [vmem:[#allocation11_spill] sm:$0xff]  ;;  %v3387_v25 = vld [vmem:[#allocation2 + $0x140] sm:$0xff]  ;;  %v3708_v1 = vld [vmem:[#allocation42_spill] sm:$0xff] }
 0x155   : > { %v886_v56 = vadd.f32 %v3704_v61, %v836_v44  ;;  %v885_v55 = vadd.f32 %v869_v18, %v835_v23  ;;  %v1702_v7 = vadd.f32 %v3010_v52, %v1686_v48  ;;  %v1069_v8 = vmul.f32 %v3276_v9, %v752_v26  ;;  %v3709_v26 = vld [vmem:[#allocation21_spill] sm:$0xff] }
 0x156   : > { %1945 = vst [vmem:[%s2375_s24 + $0x148] sm:$0xff] %v1717_v27  ;;  %v1168_v63 = vmul.f32 %v3282_v32, %v851_v33  ;;  %v984_v23 = vadd.f32 %v3287_v36, %v934_v28  ;;  %v985_v22 = vadd.f32 %v3707_v31, %v935_v58  ;;  %v1084_v44 = vadd.f32 %v1068_v46, %v1032_v10  ;;  %v3710_v33 = vld [vmem:[#allocation24_spill] sm:$0xff]  ;;  %v3711_v10 = vld [vmem:[#allocation50_spill] sm:$0xff] }
 0x157   : > { %v937_v13 = vadd.f32 %v3705_v6, %v886_v56  ;;  %v936_v19 = vadd.f32 %v3706_v54, %v885_v55  ;;  %v1718_v18 = vmax.f32 %v1702_v7, 0.0  ;;  %v1085_v48 = vadd.f32 %v1069_v8, %v1033_v30  ;;  %v3395_v36 = vld [vmem:[#allocation2 + $0x13a] sm:$0xff]  ;;  %v3713_v7 = vld [vmem:[#allocation49_spill] sm:$0xff] }
 0x158   : > { %v1274_v27 = vmul.f32 %v3186_v40, %v3377_v59  ;;  %v1034_v56 = vadd.f32 %v1018_v60, %v984_v23  ;;  %v1035_v6 = vadd.f32 %v3710_v33, %v985_v22  ;;  %v1134_v55 = vadd.f32 %v3297_v0, %v1084_v44  ;;  %v3712_v58 = vld [vmem:[#allocation12_spill] sm:$0xff]  ;;  %v3714_v54 = vld [vmem:[#allocation39_spill] sm:$0xff]  ;;  %v3717_v44 = vld [vmem:[#allocation25_spill] sm:$0xff] }
 0x159   : > { %v987_v45 = vadd.f32 %v3708_v1, %v937_v13  ;;  %v986_v61 = vadd.f32 %v3709_v26, %v936_v19  ;;  %1946 = vst [vmem:[%s2375_s24 + $0x158] sm:$0xff] %v1718_v18  ;;  %v1135_v46 = vadd.f32 %v3712_v58, %v1085_v48  ;;  %v1275_v8 = vmul.f32 %v3186_v40, %v3387_v25  ;;  %v3715_v19 = vld [vmem:[#allocation51_spill] sm:$0xff]  ;;  %v3716_v0 = vld [vmem:[#allocation80_spill] sm:$0xff]  ;;  %v3718_v1 = vld [vmem:[#allocation14_spill] sm:$0xff] }
 0x15a   : > { %v1340_v30 = vadd.f32 %v3300_v38, %v1274_v27  ;;  %v1086_v60 = vadd.f32 %v3714_v54, %v1034_v56  ;;  %v1087_v23 = vadd.f32 %v3715_v19, %v1035_v6  ;;  %v1184_v31 = vadd.f32 %v1168_v63, %v1134_v55  ;;  %v3719_v26 = vld [vmem:[#allocation65_spill] sm:$0xff]  ;;  %v3720_v33 = vld [vmem:[#allocation22_spill] sm:$0xff]  ;;  %v3721_v27 = vld [vmem:[#allocation43_spill] sm:$0xff] }
 0x15b   : > { %v1037_v28 = vadd.f32 %v3711_v10, %v987_v45  ;;  %v1036_v13 = vadd.f32 %v3713_v7, %v986_v61  ;;  %v1185_v18 = vadd.f32 %v3717_v44, %v1135_v46  ;;  %v1341_v45 = vadd.f32 %v3718_v1, %v1275_v8  ;;  %v3722_v10 = vld [vmem:[#allocation68_spill] sm:$0xff]  ;;  %v3724_v46 = vld [vmem:[#allocation61_spill] sm:$0xff] }
 0x15c   : > { %v1374_v48 = vmul.f32 %v3320_v57, %v3395_v36  ;;  %v1136_v38 = vadd.f32 %v3720_v33, %v1086_v60  ;;  %v1137_v61 = vadd.f32 %v3721_v27, %v1087_v23  ;;  %v1203_v56 = vadd.f32 %v3010_v52, %v1184_v31  ;;  %v3725_v57 = vld [vmem:[#allocation52_spill] sm:$0xff]  ;;  %v3727_v19 = vld [vmem:[#allocation81_spill] sm:$0xff] }
 0x15d   : > { %v1089_v22 = vadd.f32 %v3716_v0, %v1037_v28  ;;  %v1088_v40 = vadd.f32 %v3719_v26, %v1036_v13  ;;  %v1204_v6 = vadd.f32 %v3010_v52, %v1185_v18  ;;  %v3723_v28 = vld [vmem:[#allocation26_spill] sm:$0xff]  ;;  %v3726_v13 = vld [vmem:[#allocation53_spill] sm:$0xff]  ;;  %v1422_v31 = vmul.f32 %v3314_v16, %v3377_v59 }
 0x15e   : > { %v1390_v55 = vadd.f32 %v1374_v48, %v1340_v30  ;;  %v1391_v58 = vadd.f32 %v3723_v28, %v1341_v45  ;;  %v1186_v7 = vadd.f32 %v3725_v57, %v1136_v38  ;;  %v1187_v54 = vadd.f32 %v3726_v13, %v1137_v61  ;;  %v3728_v30 = vld [vmem:[#allocation13_spill] sm:$0xff]  ;;  %v3729_v45 = vld [vmem:[#allocation40_spill] sm:$0xff]  ;;  %v3730_v38 = vld [vmem:[#allocation54_spill] sm:$0xff] }
 0x15f   : > { %v1139_v63 = vadd.f32 %v3722_v10, %v1089_v22  ;;  %v1138_v8 = vadd.f32 %v3724_v46, %v1088_v40  ;;  %v1219_v60 = vmax.f32 %v1203_v56, 0.0  ;;  %v1220_v0 = vmax.f32 %v1204_v6, 0.0  ;;  %v3731_v6 = vld [vmem:[#allocation15_spill] sm:$0xff] }
 0x160   : > { %v1423_v22 = vmul.f32 %v3314_v16, %v3387_v25  ;;  %v1205_v18 = vadd.f32 %v3010_v52, %v1186_v7  ;;  %v1206_v1 = vadd.f32 %v3010_v52, %v1187_v54  ;;  %v1440_v48 = vadd.f32 %v3729_v45, %v1390_v55  ;;  %v3732_v28 = vld [vmem:[#allocation27_spill] sm:$0xff] }
 0x161   : > { %v1189_v23 = vadd.f32 %v3727_v19, %v1139_v63  ;;  %v1188_v44 = vadd.f32 %v3728_v30, %v1138_v8  ;;  %1235 = vst [vmem:[%s2375_s24 + $0x68] sm:$0xff] %v1219_v60  ;;  %v1438_v40 = vadd.f32 %v1422_v31, %v3352_v11  ;;  %v1441_v16 = vadd.f32 %v3730_v38, %v1391_v58  ;;  %v3733_v8 = vld [vmem:[#allocation45_spill] sm:$0xff]  ;;  %v3735_v54 = vld [vmem:[#allocation55_spill] sm:$0xff]  ;;  %v3736_v19 = vld [vmem:[#allocation56_spill] sm:$0xff]  ;;  %v730_v31 = vpop.f32.mrf.mxu3 }
 0x162   : > { %1236 = vst [vmem:[%s2375_s24 + $0x78] sm:$0xff] %v1220_v0  ;;  %v1439_v33 = vadd.f32 %v1423_v22, %v3354_v37  ;;  %v1221_v61 = vmax.f32 %v1205_v18, 0.0  ;;  %v1222_v56 = vmax.f32 %v1206_v1, 0.0  ;;  %v1472_v10 = vmul.f32 %v3252_v20, %v3258_v12  ;;  %v3734_v20 = vld [vmem:[#allocation29_spill] sm:$0xff] }
 0x163   : > { %v1208_v26 = vadd.f32 %v3010_v52, %v1189_v23  ;;  %v1207_v27 = vadd.f32 %v3010_v52, %v1188_v44  ;;  %v1490_v46 = vadd.f32 %v3732_v28, %v1440_v48  ;;  %v1491_v11 = vadd.f32 %v3733_v8, %v1441_v16  ;;  %v3737_v1 = vld [vmem:[#allocation57_spill] sm:$0xff]  ;;  %v3738_v48 = vld [vmem:[#allocation66_spill] sm:$0xff]  ;;  %v3746_v8 = vld [vmem:[#allocation28_spill] sm:$0xff] }
 0x164   : > { %v1489_v55 = vadd.f32 %v3731_v6, %v1439_v33  ;;  %1237 = vst [vmem:[%s2375_s24 + $0x88] sm:$0xff] %v1221_v61  ;;  %v1488_v37 = vadd.f32 %v1472_v10, %v1438_v40  ;;  %v1522_v58 = vmul.f32 %v3328_v5, %v3395_v36  ;;  %v1571_v7 = vmul.f32 %v3334_v2, %v3377_v59  ;;  %v3739_v40 = vld [vmem:[#allocation82_spill] sm:$0xff]  ;;  %v3740_v33 = vld [vmem:[#allocation41_spill] sm:$0xff]  ;;  %v1561_v61 = vld [vmem:[#allocation2 + $0x198] sm:$0xff] }
 0x165   : > { %v1224_v63 = vmax.f32 %v1208_v26, 0.0  ;;  %v1223_v57 = vmax.f32 %v1207_v27, 0.0  ;;  %1238 = vst [vmem:[%s2375_s24 + $0x98] sm:$0xff] %v1222_v56  ;;  %v1540_v60 = vadd.f32 %v3735_v54, %v1490_v46  ;;  %v1541_v23 = vadd.f32 %v3736_v19, %v1491_v11  ;;  %v3742_v56 = vld [vmem:[#allocation16_spill] sm:$0xff]  ;;  %v3743_v10 = vld [vmem:[#allocation46_spill] sm:$0xff] }
 0x166   : > { %v1539_v13 = vadd.f32 %v3734_v20, %v1489_v55  ;;  %v1572_v0 = vmul.f32 %v3334_v2, %v3387_v25  ;;  %v1538_v22 = vadd.f32 %v1522_v58, %v1488_v37  ;;  %v1587_v30 = vadd.f32 %v1571_v7, %v3357_v21  ;;  %v3745_v55 = vld [vmem:[#allocation69_spill] sm:$0xff]  ;;  %v741_v37 = vld [vmem:[#allocation2] sm:$0xff]  ;;  %v3747_v58 = vld [vmem:[#allocation30_spill] sm:$0xff] }
 0x167   : > { %1239 = vst [vmem:[%s2375_s24 + $0xa8] sm:$0xff] %v1223_v57  ;;  %v1621_v44 = vmul.f32 %v3155_v51, %v3258_v12  ;;  %v1671_v59 = vmul.f32 %v3340_v35, %v3395_v36  ;;  %v1591_v26 = vadd.f32 %v3738_v48, %v1540_v60  ;;  %v1592_v25 = vadd.f32 %v3739_v40, %v1541_v23  ;;  %v3748_v7 = vld [vmem:[#allocation59_spill] sm:$0xff]  ;;  %v3749_v19 = vld [vmem:[#allocation58_spill] sm:$0xff] }
 0x168   : > { %1240 = vst [vmem:[%s2375_s24 + $0xb8] sm:$0xff] %v1224_v63  ;;  %v1588_v18 = vadd.f32 %v1572_v0, %v3364_v24  ;;  %v1590_v45 = vadd.f32 %v3737_v1, %v1539_v13  ;;  %v1589_v38 = vadd.f32 %v3740_v33, %v1538_v22  ;;  %v3741_v21 = vmax.f32 %v3219_v4, 0.0  ;;  %v3744_v24 = vld [vmem:[#allocation67_spill] sm:$0xff] }
 0x169   : > { %v1637_v16 = vadd.f32 %v1621_v44, %v1587_v30  ;;  %v731_v12 = vadd.f32 %v3171_v3, %v730_v31  ;;  %v1641_v6 = vadd.f32 %v3744_v24, %v1591_v26  ;;  %v1642_v28 = vadd.f32 %v3745_v55, %v1592_v25  ;;  %v2065_v55 = vld [vmem:[#allocation2 + $0x20] sm:$0xff] }
 0x16a   : > { %v691_v27 = vmul.f32 0.0, %v3741_v21  ;;  %v1638_v36 = vadd.f32 %v3742_v56, %v1588_v18  ;;  %v1640_v63 = vadd.f32 %v3743_v10, %v1590_v45  ;;  %v1528_v46 = vmul.f32 %v3328_v5, %v3138_v17 }
 0x16b   : > { %v1639_v11 = vadd.f32 %v3746_v8, %v1589_v38  ;;  %v1687_v57 = vadd.f32 %v1671_v59, %v1637_v16  ;;  %v734_v4 = vmax.f32 %v731_v12, 0.0  ;;  %v1691_v13 = vadd.f32 %v3022_v34, %v1641_v6 }
 0x16c   : > { %693 = vst [vmem:[#allocation2 + $0x9] sm:$0xff] %v691_v27  ;;  %v1688_v3 = vadd.f32 %v3747_v58, %v1638_v36  ;;  %v1690_v20 = vadd.f32 %v3748_v7, %v1640_v63  ;;  %v1692_v54 = vadd.f32 %v3031_v49, %v1642_v28  ;;  %v1579_v60 = vmul.f32 %v3334_v2, %v1561_v61 }
 0x16d   : > { %v1689_v23 = vadd.f32 %v3749_v19, %v1639_v11  ;;  %v1703_v17 = vadd.f32 %v3010_v52, %v1687_v57  ;;  %v737_v0 = vmul.f32 0.0, %v734_v4  ;;  %v1707_v30 = vadd.f32 %v3010_v52, %v1691_v13 }
 0x16e   : > { %v1704_v31 = vadd.f32 %v3010_v52, %v1688_v3  ;;  %v1706_v22 = vadd.f32 %v3010_v52, %v1690_v20  ;;  %v1708_v44 = vadd.f32 %v3010_v52, %v1692_v54  ;;  %v759_v34 = vmul.f32 %v3180_v50, %v741_v37 }
 0x16f   : > { %v1705_v49 = vadd.f32 %v3010_v52, %v1689_v23  ;;  %v1719_v59 = vmax.f32 %v1703_v17, 0.0  ;;  %740 = vst [vmem:[#allocation2 + $0x1a1] sm:$0xff] %v737_v0  ;;  %v1544_v18 = vadd.f32 %v1528_v46, %v3069_v47  ;;  %v809_v48 = vmul.f32 %v3229_v42, %v3206_v15 }
 0x170   : > { %v1720_v1 = vmax.f32 %v1704_v31, 0.0  ;;  %v1722_v45 = vmax.f32 %v1706_v22, 0.0  ;;  %v1723_v40 = vmax.f32 %v1707_v30, 0.0  ;;  %v1529_v25 = vmul.f32 %v3328_v5, %v3142_v53  ;;  %v2063_v53 = vld [vmem:[%s2375_s24] sm:$0xff]  ;;  %v3750_v30 = vld [vmem:[#allocation72_spill] sm:$0xff] }
 0x171   : > { %v1721_v26 = vmax.f32 %v1705_v49, 0.0  ;;  %1947 = vst [vmem:[%s2375_s24 + $0x168] sm:$0xff] %v1719_v59  ;;  %v1595_v33 = vadd.f32 %v1579_v60, %v1544_v18  ;;  %v1629_v38 = vmul.f32 %v3155_v51, %v3216_v62  ;;  %v1724_v47 = vmax.f32 %v1708_v44, 0.0  ;;  %v2064_v62 = vld [vmem:[#allocation2 + $0x18] sm:$0xff]  ;;  %v2068_v60 = vld [vmem:[#allocation2 + $0x22] sm:$0xff]  ;;  %v2070_v22 = vld [vmem:[%s2375_s24 + $0x20] sm:$0xff] }
 0x172   : > { %1948 = vst [vmem:[%s2375_s24 + $0x178] sm:$0xff] %v1720_v1  ;;  %v825_v61 = vadd.f32 %v809_v48, %v759_v34  ;;  %v810_v56 = vmul.f32 %v3229_v42, %v691_v27  ;;  %v960_v5 = vmul.f32 %v2063_v53, %v3235_v41  ;;  %v910_v10 = vmul.f32 %v2064_v62, %v3370_v29  ;;  %v2071_v44 = vld [vmem:[#allocation2 + $0x38] sm:$0xff]  ;;  %v2072_v1 = vld [vmem:[%s2375_s24 + $0x30] sm:$0xff] }
 0x173   : > { %v742_v16 = vld [vmem:[#allocation2 + $0x8] sm:$0xff]  ;;  %1949 = vst [vmem:[%s2375_s24 + $0x188] sm:$0xff] %v1721_v26  ;;  %v1545_v42 = vadd.f32 %v1529_v25, %v3131_v39  ;;  %v1645_v27 = vadd.f32 %v1629_v38, %v1595_v33  ;;  %v1630_v46 = vmul.f32 %v3155_v51, %v737_v0  ;;  %v1011_v19 = vmul.f32 %v2068_v60, %v3293_v14  ;;  %v2073_v48 = vld [vmem:[#allocation2 + $0x32] sm:$0xff] }
 0x174   : > { %v841_v21 = vld [vmem:[#allocation2 + $0x2] sm:$0xff]  ;;  %v842_v12 = vld [vmem:[#allocation2 + $0xa] sm:$0xff]  ;;  %v760_v15 = vmul.f32 %v3180_v50, %v742_v16  ;;  %1950 = vst [vmem:[%s2375_s24 + $0x198] sm:$0xff] %v1722_v45  ;;  %v911_v50 = vmul.f32 %v2065_v55, %v3370_v29  ;;  %v2067_v29 = vld [vmem:[#allocation2 + $0x1a] sm:$0xff]  ;;  %v1063_v34 = vmul.f32 %v2071_v44, %v3276_v9  ;;  %v1113_v45 = vmul.f32 %v2072_v1, %v3750_v30 }
 0x175   : > { %v859_v36 = vmul.f32 %v3270_v43, %v841_v21  ;;  %1951 = vst [vmem:[%s2375_s24 + $0x1a8] sm:$0xff] %v1723_v40  ;;  %v860_v24 = vmul.f32 %v3270_v43, %v842_v12  ;;  %v2066_v43 = vld [vmem:[%s2375_s24 + $0x10] sm:$0xff]  ;;  %v1010_v39 = vmul.f32 %v2067_v29, %v3293_v14  ;;  %v1162_v26 = vmul.f32 %v2073_v48, %v3282_v32 }
 0x176   : > { %v826_v63 = vadd.f32 %v810_v56, %v760_v15  ;;  %1952 = vst [vmem:[%s2375_s24 + $0x1b8] sm:$0xff] %v1724_v47  ;;  %v1562_v28 = vld [vmem:[#allocation2 + $0x1a0] sm:$0xff]  ;;  %v961_v3 = vmul.f32 %v2066_v43, %v3235_v41 }
 0x177   : > { %v875_v6 = vadd.f32 %v859_v36, %v825_v61  ;;  %v1661_v8 = vld [vmem:[#allocation2 + $0x19a] sm:$0xff]  ;;  %v1662_v11 = vld [vmem:[#allocation2 + $0x1a2] sm:$0xff]  ;;  %v1580_v37 = vmul.f32 %v3334_v2, %v1562_v28  ;;  %v2069_v2 = vld [vmem:[#allocation2 + $0x30] sm:$0xff] }
 0x178   : > { %v876_v57 = vadd.f32 %v860_v24, %v826_v63  ;;  %v1679_v58 = vmul.f32 %v3340_v35, %v1661_v8  ;;  %v1680_v7 = vmul.f32 %v3340_v35, %v1662_v11  ;;  %v1062_v23 = vmul.f32 %v2069_v2, %v3276_v9  ;;  %v2074_v9 = vld [vmem:[#allocation2 + $0x3a] sm:$0xff] }
 0x179   : > { %v926_v4 = vadd.f32 %v910_v10, %v875_v6  ;;  %v1596_v51 = vadd.f32 %v1580_v37, %v1545_v42  ;;  %v1112_v35 = vmul.f32 %v2070_v22, %v3750_v30  ;;  %v1163_v38 = vmul.f32 %v2074_v9, %v3282_v32 }
 0x17a   : > { %v927_v20 = vadd.f32 %v911_v50, %v876_v57  ;;  %v1695_v54 = vadd.f32 %v1679_v58, %v1645_v27 }
 0x17b   : > { %v976_v13 = vadd.f32 %v960_v5, %v926_v4  ;;  %v1646_v0 = vadd.f32 %v1630_v46, %v1596_v51 }
 0x17c   : > { %v977_v17 = vadd.f32 %v961_v3, %v927_v20  ;;  %v1711_v31 = vadd.f32 %v3010_v52, %v1695_v54 }
 0x17d   : > { %v1026_v41 = vadd.f32 %v1010_v39, %v976_v13  ;;  %v1696_v18 = vadd.f32 %v1680_v7, %v1646_v0 }
 0x17e   : > { %v1027_v49 = vadd.f32 %v1011_v19, %v977_v17  ;;  %v1727_v14 = vmax.f32 %v1711_v31, 0.0 }
 0x17f   : > { %v1078_v59 = vadd.f32 %v1062_v23, %v1026_v41  ;;  %v1712_v33 = vadd.f32 %v3010_v52, %v1696_v18 }
 0x180   : > { %v1079_v40 = vadd.f32 %v1063_v34, %v1027_v49  ;;  %1955 = vst [vmem:[%s2375_s24 + $0x1e8] sm:$0xff] %v1727_v14 }
 0x181   : > { %v1128_v25 = vadd.f32 %v1112_v35, %v1078_v59  ;;  %v1728_v21 = vmax.f32 %v1712_v33, 0.0 }
 0x182   : > { %v1129_v47 = vadd.f32 %v1113_v45, %v1079_v40 }
 0x183   : > { %v1178_v16 = vadd.f32 %v1162_v26, %v1128_v25  ;;  %1956 = vst [vmem:[%s2375_s24 + $0x1f8] sm:$0xff] %v1728_v21 }
 0x184   : > { %v1179_v12 = vadd.f32 %v1163_v38, %v1129_v47 }
 0x185   : > { %v1197_v61 = vadd.f32 %v3010_v52, %v1178_v16 }
 0x186   : > { %v1198_v15 = vadd.f32 %v3010_v52, %v1179_v12 }
 0x187   : > { %v1213_v56 = vmax.f32 %v1197_v61, 0.0 }
 0x188   : > { %v1214_v36 = vmax.f32 %v1198_v15, 0.0 }
 0x189   : > { %1229 = vst [vmem:[%s2375_s24 + $0x8] sm:$0xff] %v1213_v56 }
 0x18a   : > { %1230 = vst [vmem:[%s2375_s24 + $0x18] sm:$0xff] %v1214_v36 }
 0x18b   : > { %2102 = shalt.err (!%p2099_p5)
}
 0x18c   : > { %s2156_s16 = smov 256   ;;  %s2157_s24 = smov 16  }
 0x18d   : > { %1966 = dma.vmem_to_hbm [thread:$0]  (%p2228_p4), %s1762_s21, 8192, %s1764_s29, %s1746_s7, %s2156_s16, %s2156_s16, %s2157_s24  }
 0x18e PF: > { %p1972_p6 = scmp.ge.s32.totalorder %s2153_s23, 2  ;;  %s1778_s15 = sand.u32 1, %s2133_s18  }
 0x18f   : > { %s1779_s17 = scalar_lea.sflag [#allocation4], %s1778_s15 }
 0x190   : > { %p1969_p7 = pnand %p1972_p6, %p2235_p8 }
 0x192   : > { %p1970_p9 = pneg %p1969_p7 }
 0x194   : > { %2128 = dma.done.wait (%p1970_p9), %s1779_s17, 8192  }
 0x195   : > { %2130 = vsyncadd (%p1970_p9), %s1779_s17, 4294959104  ;;  %s18_s23 = sadd.s32 1, %s2153_s23   ;;  %s3751_s18 = smov %s2137_s19 }
 0x196   : > { %p15_p10 = scmp.ge.s32.totalorder %s18_s23, 4   ;;  %s3752_s19 = smov %s2141_s20 }
 0x197   : > { %s3753_s20 = smov %s2241_s6  ;;  %s3754_s21 = smov %s2149_s22 }
 0x198   : > { %s3755_s22 = smov %s3757_s26  ;;  %17 = sbr.rel (!%p15_p10) target bundleno = 4 (0x4), region = 88 }
 0x19d   :  { %1785 = vsyncpa [#allocation4], 1 }
 0x19e   :  { %1787 = vsyncpa [#allocation4 + $0x1], 1 }

</bundles_post_ra>
